<compile_context>
chip_gen: v5e
topology: v5e:2x2
jax: 0.10.0
libtpu: 0.0.40
codegen_flags: <defaults>
</compile_context>

<pallas_src>
import functools
from typing import NamedTuple

import jax
import jax.numpy as jnp
from jax.experimental import pallas as pl
from jax.experimental.pallas import tpu as pltpu

ALPHA = 0.2        # LeakyReLU negative slope (module default in MOGONET usage)
NEG_INF = -1e12    # mask value from the reference code


def _round_up(x, m):
    return ((x + m - 1) // m) * m


def _vmem_budget_bytes():
    """Generation-aware VMEM budget: physical capacity minus Mosaic scratch headroom."""
    try:
        cap = int(pltpu.get_tpu_info().vmem_capacity_bytes)
    except Exception:
        cap = 64 * 1024 * 1024        # conservative fallback (v7x per-TC VMEM)
    return min(int(cap * 0.8), cap - (8 << 20))   # ~100 MiB on 128 MiB chips, ~51 MiB on v7x


class _Plan(NamedTuple):
    tm: int
    n_pad: int
    fout_pad: int
    vmem_limit: int


def gat_plan(N, Fin, Fout, *, block_m=None,
             mxu_dtype=jnp.float32, softmax_dtype=jnp.float32):
    """Pick the row-tile size / padding for this graph + dtype config."""
    budget = _vmem_budget_bytes()
    if block_m is None:
        # 128 MiB chips (v5e/v6e): big tiles amortize per-step overhead; v7x: smaller.
        block_m = 512 if budget >= (80 << 20) else 256
    fout_pad = _round_up(Fout, 128)
    hb = jnp.dtype(mxu_dtype).itemsize      # h is stored in the MXU dtype
    sb = jnp.dtype(softmax_dtype).itemsize

    def _fits(tm):
        n_pad = _round_up(N, tm)
        k1 = (2 * tm * Fin * 4                  # inp row stripe (double-buffered, f32)
              + Fin * fout_pad * hb             # W (single-buffered)
              + 2 * tm * fout_pad * hb          # h output stripe
              + 2 * 8 * tm * 4)                 # f2^T output stripe (sublane-padded)
        k2 = (2 * tm * n_pad                    # int8 adjacency stripe (double-buffered)
              + n_pad * fout_pad * hb           # resident h (single-buffered)
              + 8 * n_pad * 4                   # f2^T (sublane-padded)
              + fout_pad * 128 * hb             # a1 (lane-padded)
              + 2 * tm * fout_pad * 4           # output stripe (f32)
              + tm * n_pad * (5 * sb + 1))      # in-kernel softmax temporaries + mask
        return max(k1, k2) <= budget

    tm = max(128, min(_round_up(block_m, 128), _round_up(N, 128)))
    while tm > 128 and not _fits(tm):
        tm -= 128
    return _Plan(tm=tm, n_pad=_round_up(N, tm), fout_pad=fout_pad, vmem_limit=budget)


def gat_prepare_adj(adj, n_pad):
    """One-time per graph (hoisted out of the forward): nonzero->1 int8 adjacency,
    zero-padded to (n_pad, n_pad), self-loops on the padding diagonal so padded query
    rows have a non-empty softmax (those rows are sliced away afterwards)."""
    N = adj.shape[0]
    adj_i8 = (adj > 0).astype(jnp.int8)
    adj_p = jnp.zeros((n_pad, n_pad), jnp.int8).at[:N, :N].set(adj_i8)
    if n_pad > N:
        idx = jnp.arange(N, n_pad)
        adj_p = adj_p.at[idx, idx].set(1)
    return adj_p


# --------------------------- kernels ---------------------------------------

def _proj_kernel(inp_ref, w_ref, a2t_ref, h_ref, f2t_ref, *, mxu_dtype):
    # h = inp @ W                                     (tm, Fp)   MXU, f32 accumulate
    x = inp_ref[...].astype(mxu_dtype)
    h32 = jnp.dot(x, w_ref[...], preferred_element_type=jnp.float32)
    h = h32.astype(h_ref.dtype)            # single cast, reused for the store and f2
    h_ref[...] = h
    # f2^T[0, i] = a2 . h_i  -> lane-dense (1, tm) block (contraction over features)
    f2t_ref[...] = jax.lax.dot_general(
        a2t_ref[...], h,
        dimension_numbers=(((1,), (1,)), ((), ())),
        preferred_element_type=jnp.float32)


def _attn_kernel(adj_ref, h_ref, f2t_ref, a1_ref, out_ref, *, tm, softmax_dtype):
    # Row tile of h comes from the resident VMEM copy (no extra HBM traffic).
    row0 = pl.multiple_of(pl.program_id(0) * tm, tm)
    h_tile = h_ref[pl.ds(row0, tm), :]                                   # (tm, Fp)
    # f1_i = a1 . h_i   (tiny MXU matvec, f32 accumulate)
    f1 = jnp.dot(h_tile, a1_ref[...], preferred_element_type=jnp.float32)  # (tm, 1)

    # e = LeakyReLU(f1 + f2^T) — elementwise chain in softmax_dtype
    # (bf16 recommended on v6e/v7x; keep f32 on v5e which has no bf16 VPU/EUP).
    e = f1.astype(softmax_dtype) + f2t_ref[...].astype(softmax_dtype)      # (tm, N)
    e = jnp.where(e > 0, e, jnp.asarray(ALPHA, softmax_dtype) * e)

    # Single fused mask select; exp(-1e12 - m) underflows to exactly 0, so masked keys
    # drop out (the wrapper guarantees self-loops -> no empty softmax rows).
    mask = adj_ref[...] != 0
    e = jnp.where(mask, e, jnp.asarray(NEG_INF, softmax_dtype))
    m = jnp.max(e, axis=1, keepdims=True)                    # max is exact in any dtype
    p = jnp.exp(e - m)                                       # (tm, N)
    s = jnp.sum(p, axis=1, keepdims=True, dtype=jnp.float32)  # row sums in f32
    # TODO(synk): training-mode dropout on p would use pltpu.prng_seed/prng_random_bits.

    # h' = softmax(e) @ h  — normalize after the MXU matmul (one fewer (tm, N) multiply)
    hp = jnp.dot(p.astype(h_ref.dtype), h_ref[...],
                 preferred_element_type=jnp.float32)         # (tm, Fp)  MXU
    hp = hp * pl.reciprocal(s, approx=True)                  # EUP slot, ~free
    # ELU (concat=True branch). exp(x)-1 kept (expm1 lowering in Mosaic not guaranteed);
    # absolute error near 0 is ~1e-7, negligible at our tolerances.
    out_ref[...] = jnp.where(hp > 0, hp, jnp.exp(hp) - 1.0).astype(out_ref.dtype)


# --------------------------- forward ----------------------------------------

@functools.partial(jax.jit,
                   static_argnames=("tm", "mxu_dtype", "softmax_dtype", "vmem_limit"))
def _gat_forward_core(inp, adj_p, W, a, *, tm, mxu_dtype, softmax_dtype, vmem_limit):
    """inp: [N, Fin]; adj_p: pre-packed int8 [n_pad, n_pad] (see gat_prepare_adj);
    W: [Fin, Fout]; a: [2*Fout, 1]."""
    N, Fin = inp.shape
    Fout = W.shape[1]
    n_pad = adj_p.shape[0]
    assert adj_p.shape == (n_pad, n_pad) and n_pad % tm == 0 and n_pad >= N
    fout_pad = _round_up(Fout, 128)
    grid = (n_pad // tm,)
    h_dtype = mxu_dtype          # h is stored in the MXU input dtype

    # small per-call tensors: pad / repack (adj is pre-packed by the caller)
    inp_p = jnp.zeros((n_pad, Fin), jnp.float32).at[:N].set(inp.astype(jnp.float32))
    W_p = jnp.zeros((Fin, fout_pad), mxu_dtype).at[:, :Fout].set(W.astype(mxu_dtype))
    a1 = jnp.zeros((fout_pad, 1), h_dtype).at[:Fout].set(a[:Fout].astype(h_dtype))
    a2t = jnp.zeros((1, fout_pad), mxu_dtype).at[:, :Fout].set(a[Fout:].astype(mxu_dtype).T)

    invariant = pl.Buffered(buffer_count=1)   # grid-invariant inputs: single VMEM buffer

    # ---- kernel 1: h = inp @ W ; f2^T (lane-dense (1, tm) stores) -----------
    h, f2t = pl.pallas_call(
        functools.partial(_proj_kernel, mxu_dtype=mxu_dtype),
        out_shape=(jax.ShapeDtypeStruct((n_pad, fout_pad), h_dtype),
                   jax.ShapeDtypeStruct((1, n_pad), jnp.float32)),
        grid=grid,
        in_specs=[
            pl.BlockSpec((tm, Fin), lambda i: (i, 0)),                      # inp stripe
            pl.BlockSpec((Fin, fout_pad), lambda i: (0, 0), pipeline_mode=invariant),
            pl.BlockSpec((1, fout_pad), lambda i: (0, 0), pipeline_mode=invariant),
        ],
        out_specs=(pl.BlockSpec((tm, fout_pad), lambda i: (i, 0)),          # h stripe
                   pl.BlockSpec((1, tm), lambda i: (0, i))),                # f2^T, lane-dense
        compiler_params=pltpu.CompilerParams(
            dimension_semantics=("parallel",),
            vmem_limit_bytes=vmem_limit),
    )(inp_p, W_p, a2t)

    # ---- kernel 2: masked softmax attention + aggregation + ELU -------------
    out = pl.pallas_call(
        functools.partial(_attn_kernel, tm=tm, softmax_dtype=softmax_dtype),
        out_shape=jax.ShapeDtypeStruct((n_pad, fout_pad), jnp.float32),
        grid=grid,
        in_specs=[
            pl.BlockSpec((tm, n_pad), lambda i: (i, 0)),                    # int8 adj stripe
            pl.BlockSpec((n_pad, fout_pad), lambda i: (0, 0), pipeline_mode=invariant),
            pl.BlockSpec((1, n_pad), lambda i: (0, 0), pipeline_mode=invariant),
            pl.BlockSpec((fout_pad, 1), lambda i: (0, 0), pipeline_mode=invariant),
        ],
        out_specs=pl.BlockSpec((tm, fout_pad), lambda i: (i, 0)),
        compiler_params=pltpu.CompilerParams(
            dimension_semantics=("parallel",),
            vmem_limit_bytes=vmem_limit),
    )(adj_p, h, f2t, a1)

    return out[:N, :Fout]


def gat_forward(inp, adj, W, a, *, block_m=None,
                mxu_dtype=jnp.float32, softmax_dtype=jnp.float32):
    """Convenience entry point (re-packs adj every call).  For repeated calls on a static
    graph, call gat_plan + gat_prepare_adj once and _gat_forward_core directly (see demo).
    mxu_dtype / softmax_dtype = bfloat16 recommended on v6e/v7x; keep float32 on v5e
    (no bf16 VPU/EUP) or when bit-closest numerics are required."""
    N, Fin = inp.shape
    Fout = W.shape[1]
    plan = gat_plan(N, Fin, Fout, block_m=block_m,
                    mxu_dtype=mxu_dtype, softmax_dtype=softmax_dtype)
    adj_p = gat_prepare_adj(adj, plan.n_pad)
    return _gat_forward_core(inp, adj_p, W, a, tm=plan.tm, mxu_dtype=mxu_dtype,
                             softmax_dtype=softmax_dtype, vmem_limit=plan.vmem_limit)


# --------------------------- reference + demo -------------------------------

def gat_reference(inp, adj, W, a):
    """Pure-JAX reference matching the PyTorch forward (eval mode)."""
    Fout = W.shape[1]
    h = inp @ W
    f1 = h @ a[:Fout]
    f2 = h @ a[Fout:]
    e = f1 + f2.T
    e = jnp.where(e > 0, e, ALPHA * e)
    attn = jax.nn.softmax(jnp.where(adj > 0, e, NEG_INF), axis=1)
    hp = attn @ h
    return jnp.where(hp > 0, hp, jnp.expm1(hp))


def xavier_uniform(key, shape, gain):
    fan_in, fan_out = shape[0], shape[1]
    bound = gain * jnp.sqrt(6.0 / (fan_in + fan_out))
    return jax.random.uniform(key, shape, jnp.float32, -bound, bound)


if __name__ == "__main__":
    N, Fin, Fout = 200, 64, 128       # small; lane-dense output; exercises padding (N->256)

    key = jax.random.PRNGKey(0)
    k_inp, k_adj, k_w, k_a = jax.random.split(key, 4)

    W = xavier_uniform(k_w, (Fin, Fout), gain=1.414)        # matches xavier_uniform_, gain=1.414
    a = xavier_uniform(k_a, (2 * Fout, 1), gain=1.414)

    inp = jax.random.normal(k_inp, (N, Fin), jnp.float32)
    adj = (jax.random.uniform(k_adj, (N, N)) > 0.7).astype(jnp.float32)
    adj = jnp.minimum(adj + jnp.eye(N, dtype=jnp.float32), 1.0)   # self-loops (no empty rows)

    ref = gat_reference(inp, adj, W, a)

    # ---- f32 path (bit-closest); adjacency packing hoisted out of the forward ----
    plan = gat_plan(N, Fin, Fout, block_m=128)               # 2 row tiles -> exercises grid
    adj_p = gat_prepare_adj(adj, plan.n_pad)                 # once per graph
    out = _gat_forward_core(inp, adj_p, W, a, tm=plan.tm,
                            mxu_dtype=jnp.float32, softmax_dtype=jnp.float32,
                            vmem_limit=plan.vmem_limit)
    jax.block_until_ready(out)
    assert out.shape == (N, Fout)
    err = float(jnp.max(jnp.abs(out - ref)))
    assert jnp.allclose(out, ref, rtol=1e-2, atol=1e-2), f"f32 max abs err {err}"

    # ---- bf16 path (v6e/v7x perf config: bf16 h storage + bf16 softmax chain) ----
    out_bf = gat_forward(inp, adj, W, a, block_m=128,
                         mxu_dtype=jnp.bfloat16, softmax_dtype=jnp.bfloat16)
    jax.block_until_ready(out_bf)
    assert out_bf.shape == (N, Fout)
    assert bool(jnp.all(jnp.isfinite(out_bf)))
    rel = float(jnp.linalg.norm(out_bf - ref) / jnp.linalg.norm(ref))
    assert rel < 0.15, f"bf16 relative error {rel}"

    print("KERNEL_OK")
</pallas_src>

<mosaic_0001>
module attributes {stable_mosaic.version = 11 : i64} {
  func.func @_proj_kernel(%arg0: i32, %arg1: memref<128x64xf32, #tpu.memory_space<vmem>>, %arg2: memref<64x128xf32, #tpu.memory_space<vmem>>, %arg3: memref<1x128xf32, #tpu.memory_space<vmem>>, %arg4: memref<128x128xf32, #tpu.memory_space<vmem>>, %arg5: memref<1x128xf32, #tpu.memory_space<vmem>>) attributes {dimension_semantics = [#tpu.dimension_semantics<parallel>], iteration_bounds = array<i64: 2>, scalar_prefetch = 0 : i64, scratch_operands = 0 : i64, tpu.core_type = #tpu.core_type<tc>, window_params = [{transform_indices = @transform_0, window_bounds = array<i64: 128, 64>}, {pipeline_mode = #tpu.pipeline_mode<synchronous>, transform_indices = @transform_1, window_bounds = array<i64: 64, 128>}, {pipeline_mode = #tpu.pipeline_mode<synchronous>, transform_indices = @transform_2, window_bounds = array<i64: 1, 128>}, {transform_indices = @transform_3, window_bounds = array<i64: 128, 128>}, {transform_indices = @transform_4, window_bounds = array<i64: 1, 128>}]} {
    %c0 = arith.constant 0 : index
    %c0_0 = arith.constant 0 : index
    %0 = vector.load %arg1[%c0, %c0_0] : memref<128x64xf32, #tpu.memory_space<vmem>>, vector<128x64xf32>
    %c0_1 = arith.constant 0 : index
    %c0_2 = arith.constant 0 : index
    %1 = vector.load %arg2[%c0_1, %c0_2] : memref<64x128xf32, #tpu.memory_space<vmem>>, vector<64x128xf32>
    %cst = arith.constant dense<0.000000e+00> : vector<128x128xf32>
    %2 = tpu.matmul %0, %1, %cst {dimension_numbers = #tpu.dot_dimension_numbers<[1], [0], [0], [1], [0, 0, 1, 1], [], []>} : vector<128x64xf32>, vector<64x128xf32>, vector<128x128xf32> -> vector<128x128xf32>
    %c0_3 = arith.constant 0 : index
    %c0_4 = arith.constant 0 : index
    %3 = vector.load %arg4[%c0_3, %c0_4] : memref<128x128xf32, #tpu.memory_space<vmem>>, vector<128x128xf32>
    tpu.vector_store %arg4[%c0_3, %c0_4], %2 {strides = array<i32>} : memref<128x128xf32, #tpu.memory_space<vmem>>, vector<128x128xf32>,
    %c0_5 = arith.constant 0 : index
    %c0_6 = arith.constant 0 : index
    %4 = vector.load %arg3[%c0_5, %c0_6] : memref<1x128xf32, #tpu.memory_space<vmem>>, vector<1x128xf32>
    %cst_7 = arith.constant dense<0.000000e+00> : vector<1x128xf32>
    %5 = tpu.matmul %4, %2, %cst_7 {dimension_numbers = #tpu.dot_dimension_numbers<[1], [1], [0], [0], [0, 0, 1, 0], [], []>} : vector<1x128xf32>, vector<128x128xf32>, vector<1x128xf32> -> vector<1x128xf32>
    %c0_8 = arith.constant 0 : index
    %c0_9 = arith.constant 0 : index
    %6 = vector.load %arg5[%c0_8, %c0_9] : memref<1x128xf32, #tpu.memory_space<vmem>>, vector<1x128xf32>
    tpu.vector_store %arg5[%c0_8, %c0_9], %5 {strides = array<i32>} : memref<1x128xf32, #tpu.memory_space<vmem>>, vector<1x128xf32>,
    return
  }
  func.func @transform_0(%arg0: i32) -> (i32, i32) {
    %c0_i32 = arith.constant 0 : i32
    %c0_i32_0 = arith.constant 0 : i32
    return %arg0, %c0_i32 : i32, i32
  }
  func.func @transform_1(%arg0: i32) -> (i32, i32) {
    %c0_i32 = arith.constant 0 : i32
    %c0_i32_0 = arith.constant 0 : i32
    %c0_i32_1 = arith.constant 0 : i32
    return %c0_i32, %c0_i32_0 : i32, i32
  }
  func.func @transform_2(%arg0: i32) -> (i32, i32) {
    %c0_i32 = arith.constant 0 : i32
    %c0_i32_0 = arith.constant 0 : i32
    %c0_i32_1 = arith.constant 0 : i32
    return %c0_i32, %c0_i32_0 : i32, i32
  }
  func.func @transform_3(%arg0: i32) -> (i32, i32) {
    %c0_i32 = arith.constant 0 : i32
    %c0_i32_0 = arith.constant 0 : i32
    return %arg0, %c0_i32 : i32, i32
  }
  func.func @transform_4(%arg0: i32) -> (i32, i32) {
    %c0_i32 = arith.constant 0 : i32
    %c0_i32_0 = arith.constant 0 : i32
    return %c0_i32, %arg0 : i32, i32
  }
}

module attributes {stable_mosaic.version = 11 : i64} {
  func.func @_attn_kernel(%arg0: i32, %arg1: memref<128x256xi8, #tpu.memory_space<vmem>>, %arg2: memref<256x128xf32, #tpu.memory_space<vmem>>, %arg3: memref<1x256xf32, #tpu.memory_space<vmem>>, %arg4: memref<128x1xf32, #tpu.memory_space<vmem>>, %arg5: memref<128x128xf32, #tpu.memory_space<vmem>>) attributes {dimension_semantics = [#tpu.dimension_semantics<parallel>], iteration_bounds = array<i64: 2>, scalar_prefetch = 0 : i64, scratch_operands = 0 : i64, tpu.core_type = #tpu.core_type<tc>, window_params = [{transform_indices = @transform_0, window_bounds = array<i64: 128, 256>}, {pipeline_mode = #tpu.pipeline_mode<synchronous>, transform_indices = @transform_1, window_bounds = array<i64: 256, 128>}, {pipeline_mode = #tpu.pipeline_mode<synchronous>, transform_indices = @transform_2, window_bounds = array<i64: 1, 256>}, {pipeline_mode = #tpu.pipeline_mode<synchronous>, transform_indices = @transform_3, window_bounds = array<i64: 128, 1>}, {transform_indices = @transform_4, window_bounds = array<i64: 128, 128>}]} {
    %c128_i32 = arith.constant 128 : i32
    %0 = arith.muli %arg0, %c128_i32 : i32
    %1 = tpu.assume_multiple %0, 128 : i32
    %2 = arith.index_cast %1 : i32 to index
    %c0 = arith.constant 0 : index
    %3 = vector.load %arg2[%2, %c0] : memref<256x128xf32, #tpu.memory_space<vmem>>, vector<128x128xf32>
    %c0_0 = arith.constant 0 : index
    %c0_1 = arith.constant 0 : index
    %4 = vector.load %arg4[%c0_0, %c0_1] : memref<128x1xf32, #tpu.memory_space<vmem>>, vector<128x1xf32>
    %cst = arith.constant dense<0.000000e+00> : vector<128x1xf32>
    %5 = tpu.matmul %3, %4, %cst {dimension_numbers = #tpu.dot_dimension_numbers<[1], [0], [0], [1], [0, 0, 1, 1], [], []>} : vector<128x128xf32>, vector<128x1xf32>, vector<128x1xf32> -> vector<128x1xf32>
    %c0_2 = arith.constant 0 : index
    %c0_3 = arith.constant 0 : index
    %6 = vector.load %arg3[%c0_2, %c0_3] : memref<1x256xf32, #tpu.memory_space<vmem>>, vector<1x256xf32>
    %7 = vector.broadcast %5 : vector<128x1xf32> to vector<128x256xf32>
    %8 = vector.broadcast %6 : vector<1x256xf32> to vector<128x256xf32>
    %9 = arith.addf %7, %8 : vector<128x256xf32>
    %cst_4 = arith.constant 0.000000e+00 : f32
    %10 = vector.broadcast %cst_4 : f32 to vector<128x256xf32>
    %11 = arith.cmpf ogt, %9, %10 : vector<128x256xf32>
    %cst_5 = arith.constant 2.000000e-01 : f32
    %12 = vector.broadcast %cst_5 : f32 to vector<128x256xf32>
    %13 = arith.mulf %12, %9 : vector<128x256xf32>
    %14 = arith.select %11, %9, %13 : vector<128x256xi1>, vector<128x256xf32>
    %c0_6 = arith.constant 0 : index
    %c0_7 = arith.constant 0 : index
    %15 = vector.load %arg1[%c0_6, %c0_7] : memref<128x256xi8, #tpu.memory_space<vmem>>, vector<128x256xi8>
    %c0_i8 = arith.constant 0 : i8
    %16 = vector.broadcast %c0_i8 : i8 to vector<128x256xi8>
    %17 = arith.cmpi ne, %15, %16 : vector<128x256xi8>
    %cst_8 = arith.constant -9.99999995E+11 : f32
    %18 = vector.broadcast %cst_8 : f32 to vector<128x256xf32>
    %19 = arith.select %17, %14, %18 : vector<128x256xi1>, vector<128x256xf32>
    %cst_9 = arith.constant dense<0xFF800000> : vector<128xf32>
    %20 = vector.multi_reduction <maximumf>, %19, %cst_9 [1] : vector<128x256xf32> to vector<128xf32>
    %21 = vector.shape_cast %20 : vector<128xf32> to vector<128x1xf32>
    %22 = vector.broadcast %21 : vector<128x1xf32> to vector<128x256xf32>
    %23 = arith.subf %19, %22 : vector<128x256xf32>
    %24 = math.exp %23 : vector<128x256xf32>
    %cst_10 = arith.constant dense<0.000000e+00> : vector<128xf32>
    %25 = vector.multi_reduction <add>, %24, %cst_10 [1] : vector<128x256xf32> to vector<128xf32>
    %26 = vector.shape_cast %25 : vector<128xf32> to vector<128x1xf32>
    %c0_11 = arith.constant 0 : index
    %c0_12 = arith.constant 0 : index
    %27 = vector.load %arg2[%c0_11, %c0_12] : memref<256x128xf32, #tpu.memory_space<vmem>>, vector<256x128xf32>
    %cst_13 = arith.constant dense<0.000000e+00> : vector<128x128xf32>
    %28 = tpu.matmul %24, %27, %cst_13 {dimension_numbers = #tpu.dot_dimension_numbers<[1], [0], [0], [1], [0, 0, 1, 1], [], []>} : vector<128x256xf32>, vector<256x128xf32>, vector<128x128xf32> -> vector<128x128xf32>
    %29 = tpu.reciprocal %26 {approx = true} : vector<128x1xf32> -> vector<128x1xf32>
    %30 = vector.broadcast %29 : vector<128x1xf32> to vector<128x128xf32>
    %31 = arith.mulf %28, %30 : vector<128x128xf32>
    %cst_14 = arith.constant 0.000000e+00 : f32
    %32 = vector.broadcast %cst_14 : f32 to vector<128x128xf32>
    %33 = arith.cmpf ogt, %31, %32 : vector<128x128xf32>
    %34 = math.exp %31 : vector<128x128xf32>
    %cst_15 = arith.constant 1.000000e+00 : f32
    %35 = vector.broadcast %cst_15 : f32 to vector<128x128xf32>
    %36 = arith.subf %34, %35 : vector<128x128xf32>
    %37 = arith.select %33, %31, %36 : vector<128x128xi1>, vector<128x128xf32>
    %c0_16 = arith.constant 0 : index
    %c0_17 = arith.constant 0 : index
    %38 = vector.load %arg5[%c0_16, %c0_17] : memref<128x128xf32, #tpu.memory_space<vmem>>, vector<128x128xf32>
    tpu.vector_store %arg5[%c0_16, %c0_17], %37 {strides = array<i32>} : memref<128x128xf32, #tpu.memory_space<vmem>>, vector<128x128xf32>,
    return
  }
  func.func @transform_0(%arg0: i32) -> (i32, i32) {
    %c0_i32 = arith.constant 0 : i32
    %c0_i32_0 = arith.constant 0 : i32
    return %arg0, %c0_i32 : i32, i32
  }
  func.func @transform_1(%arg0: i32) -> (i32, i32) {
    %c0_i32 = arith.constant 0 : i32
    %c0_i32_0 = arith.constant 0 : i32
    %c0_i32_1 = arith.constant 0 : i32
    return %c0_i32, %c0_i32_0 : i32, i32
  }
  func.func @transform_2(%arg0: i32) -> (i32, i32) {
    %c0_i32 = arith.constant 0 : i32
    %c0_i32_0 = arith.constant 0 : i32
    %c0_i32_1 = arith.constant 0 : i32
    return %c0_i32, %c0_i32_0 : i32, i32
  }
  func.func @transform_3(%arg0: i32) -> (i32, i32) {
    %c0_i32 = arith.constant 0 : i32
    %c0_i32_0 = arith.constant 0 : i32
    %c0_i32_1 = arith.constant 0 : i32
    return %c0_i32, %c0_i32_0 : i32, i32
  }
  func.func @transform_4(%arg0: i32) -> (i32, i32) {
    %c0_i32 = arith.constant 0 : i32
    %c0_i32_0 = arith.constant 0 : i32
    return %arg0, %c0_i32 : i32, i32
  }
}

</mosaic_0001>

<bundles_post_ra>
// kernel: _gat_forward_core.2
= control target key start
LH: loop header
LB: loop body
LE: loop exit
PB: predicated region body
PF: predicated region fallthrough
CT: control target
= control target key end

     0   :  { %s551_s15 = smov 0   ;;  %s662_s0 = inlined_call_operand.vmem [shape: f32[256,64], index: 0, kind: input, shape index: {}]   ;;  %s663_s1 = inlined_call_operand.vmem [shape: f32[64,128], index: 1, kind: input, shape index: {}]   ;;  %s664_s2 = inlined_call_operand.vmem [shape: f32[1,128], index: 2, kind: input, shape index: {}]   ;;  %s665_s3 = inlined_call_operand.vmem [shape: f32[256,128], index: 3, kind: output, shape index: {0}]   ;;  %s666_s4 = inlined_call_operand.vmem [shape: f32[1,256], index: 4, kind: output, shape index: {1}]  }
   0x1 LB: > { %s557_s16 = sadd.s32 4294967295, %s524_s15   ;;  %p471_p0 = scmp.ge.s32.totalorder %s524_s15, 1  ;;  %s524_s15 = sphi %s551_s15, %s15_s15  }
   0x2   : > { %p166_p1 = scmp.lt.s32.totalorder %s524_s15, 3 }
   0x4   : > { %p167_p2 = pnand %p471_p0, %p166_p1 }
   0x5   : > { %s472_s21 = sshll.u32 (!%p167_p2), %s557_s16, 4  ;;  %p207_p4 = scmp.lt.s32.totalorder (!%p167_p2), %s557_s16, 1 }
   0x6   : > { %170 = sbr.rel (%p167_p2) target bundleno = 373 (0x175), region = 32  ;;  %p196_p3 = scmp.lt.s32.totalorder (!%p167_p2), %s472_s21, 31 }
   0xb   : > { %v233_v0 = vld [vmem:[%s663_s1 + $0x38] sm:$0xff]  ;;  %v232_v1 = vld [vmem:[%s663_s1 + $0x30] sm:$0xff]  ;;  %v231_v2 = vld [vmem:[%s663_s1 + $0x28] sm:$0xff]  ;;  %s668_s21 = smov (!%p196_p3, %s472_s21), 31  ;;  %vm234_vm0 = vcmask 523264   ;;  %s670_s16 = smov (!%p207_p4, %s557_s16), 1 }
   0xc   : > { %494 = vmatpush.msra.mxu2 %v233_v0  ;;  %495 = vmatpush.msra.mxu3 %v233_v0  ;;  %v230_v3 = vld [vmem:[%s663_s1 + $0x20] sm:$0xff]  ;;  %v229_v4 = vld [vmem:[%s663_s1 + $0x18] sm:$0xff]  ;;  %s473_s28 = sshll.u32 %s668_s21, 3  ;;  %v228_v5 = vld [vmem:[%s663_s1 + $0x10] sm:$0xff]  ;;  %s209_s21 = scalar_lea.vmem %s666_s4, %s670_s16 }
   0xd   : > { %291 = vmatpush.msra.mxu0 %v233_v0  ;;  %v227_v6 = vld [vmem:[%s663_s1 + $0x8] sm:$0xff]  ;;  %s591_s9 = scalar_lea.vmem %s662_s0, %s473_s28  ;;  %v226_v7 = vld [vmem:[%s663_s1] sm:$0xff]  ;;  %s633_s14 = scalar_lea.vmem %s665_s3, %s473_s28 }
   0xe   : > { %496 = vmatpush.msra.mxu2 %v232_v1  ;;  %497 = vmatpush.msra.mxu3 %v232_v1  ;;  %v216_v8 = vld [vmem:[%s591_s9 + $0x30] sm:$0xff]  ;;  %v222_v9 = vld [vmem:[%s591_s9 + $0x60] sm:$0xff]  ;;  %v217_v11 = vld [vmem:[%s591_s9 + $0x38] sm:$0xff] }
   0xf   : > { %292 = vmatpush.msra.mxu0 %v232_v1  ;;  %v210_v10 = vld [vmem:[%s591_s9] sm:$0xff]  ;;  %v223_v12 = vld [vmem:[%s591_s9 + $0x68] sm:$0xff]  ;;  %v224_v15 = vld [vmem:[%s591_s9 + $0x70] sm:$0xff] }
  0x10   : > { %498 = vmatpush.msra.mxu2 %v231_v2  ;;  %499 = vmatpush.msra.mxu3 %v231_v2  ;;  %v211_v13 = vld [vmem:[%s591_s9 + $0x8] sm:$0xff]  ;;  %v218_v14 = vld [vmem:[%s591_s9 + $0x40] sm:$0xff]  ;;  %v212_v16 = vld [vmem:[%s591_s9 + $0x10] sm:$0xff] }
  0x11   : > { %293 = vmatpush.msra.mxu0 %v231_v2  ;;  %v219_v17 = vld [vmem:[%s591_s9 + $0x48] sm:$0xff]  ;;  %v225_v18 = vld [vmem:[%s591_s9 + $0x78] sm:$0xff]  ;;  %v220_v20 = vld [vmem:[%s591_s9 + $0x50] sm:$0xff] }
  0x12   : > { %500 = vmatpush.msra.mxu2 %v230_v3  ;;  %501 = vmatpush.msra.mxu3 %v230_v3  ;;  %v213_v19 = vld [vmem:[%s591_s9 + $0x18] sm:$0xff]  ;;  %v214_v21 = vld [vmem:[%s591_s9 + $0x20] sm:$0xff]  ;;  %v215_v23 = vld [vmem:[%s591_s9 + $0x28] sm:$0xff] }
  0x13   : > { %294 = vmatpush.msra.mxu0 %v230_v3  ;;  %v221_v22 = vld [vmem:[%s591_s9 + $0x58] sm:$0xff]  ;;  %v364_v40 = vld [vmem:[%s664_s2] sm:$0x1] }
  0x14   : > { %502 = vmatpush.msra.mxu2 %v229_v4  ;;  %503 = vmatpush.msra.mxu3 %v229_v4 }
  0x15   : > { %295 = vmatpush.msra.mxu0 %v229_v4 }
  0x16   : > { %504 = vmatpush.msra.mxu2 %v228_v5  ;;  %505 = vmatpush.msra.mxu3 %v228_v5 }
  0x17   : > { %296 = vmatpush.msra.mxu0 %v228_v5 }
  0x18   : > { %506 = vmatpush.msra.mxu2 %v227_v6  ;;  %507 = vmatpush.msra.mxu3 %v227_v6 }
  0x19   : > { %297 = vmatpush.msra.mxu0 %v227_v6 }
  0x1a   : > { %508 = vmatpush.msra.mxu2 %v226_v7  ;;  %509 = vmatpush.msra.mxu3 %v226_v7 }
  0x1b   : > { %482 = vmatmul.msk.f32.vlgmr.msra.gmra.mxu2 %vm234_vm0, %v216_v8  ;;  %488 = vmatmul.msk.f32.vlgmr.msra.gmra.mxu3 %vm234_vm0, %v222_v9 }
  0x1c   : > { %298 = vmatpush.msra.mxu0 %v226_v7 }
  0x1d   : > { %476 = vmatmul.msk.f32.vlgmr.msra.gmra.mxu0 %vm234_vm0, %v210_v10 }
  0x23   : > { %483 = vmatmul.msk.f32.gmra.mxu2 %vm234_vm0, %v217_v11  ;;  %489 = vmatmul.msk.f32.gmra.mxu3 %vm234_vm0, %v223_v12 }
  0x25   : > { %477 = vmatmul.msk.f32.gmra.mxu0 %vm234_vm0, %v211_v13 }
  0x2b   : > { %484 = vmatmul.msk.f32.gmra.mxu2 %vm234_vm0, %v218_v14  ;;  %490 = vmatmul.msk.f32.gmra.mxu3 %vm234_vm0, %v224_v15 }
  0x2d   : > { %478 = vmatmul.msk.f32.gmra.mxu0 %vm234_vm0, %v212_v16 }
  0x33   : > { %485 = vmatmul.msk.f32.gmra.mxu2 %vm234_vm0, %v219_v17  ;;  %491 = vmatmul.msk.f32.gmra.mxu3 %vm234_vm0, %v225_v18 }
  0x35   : > { %479 = vmatmul.msk.f32.gmra.mxu0 %vm234_vm0, %v213_v19 }
  0x3b   : > { %486 = vmatmul.msk.f32.gmra.mxu2 %vm234_vm0, %v220_v20 }
  0x3d   : > { %480 = vmatmul.msk.f32.gmra.mxu0 %vm234_vm0, %v214_v21 }
  0x43   : > { %487 = vmatmul.msk.f32.gmra.mxu2 %vm234_vm0, %v221_v22 }
  0x45   : > { %481 = vmatmul.msk.f32.gmra.mxu0 %vm234_vm0, %v215_v23 }
  0x9a   : > { %v300_v24 = vpop.f32.mrf.mxu0 }
  0x9b   : > { %348 = vst [vmem:[%s633_s14] sm:$0xff] %v300_v24 }
  0x9e   : > { %v318_v25 = vpop.f32.mrf.mxu2  ;;  %v336_v26 = vpop.f32.mrf.mxu3 }
  0x9f   : > { %354 = vst [vmem:[%s633_s14 + $0x30] sm:$0xff] %v318_v25 }
  0xa0   : > { %360 = vst [vmem:[%s633_s14 + $0x60] sm:$0xff] %v336_v26 }
  0xa2   : > { %v303_v27 = vpop.f32.mrf.mxu0 }
  0xa3   : > { %349 = vst [vmem:[%s633_s14 + $0x8] sm:$0xff] %v303_v27 }
  0xa6   : > { %v321_v28 = vpop.f32.mrf.mxu2  ;;  %v339_v29 = vpop.f32.mrf.mxu3 }
  0xa7   : > { %355 = vst [vmem:[%s633_s14 + $0x38] sm:$0xff] %v321_v28 }
  0xa8   : > { %361 = vst [vmem:[%s633_s14 + $0x68] sm:$0xff] %v339_v29 }
  0xaa   : > { %v306_v30 = vpop.f32.mrf.mxu0 }
  0xab   : > { %350 = vst [vmem:[%s633_s14 + $0x10] sm:$0xff] %v306_v30 }
  0xae   : > { %v324_v31 = vpop.f32.mrf.mxu2  ;;  %v342_v32 = vpop.f32.mrf.mxu3 }
  0xaf   : > { %356 = vst [vmem:[%s633_s14 + $0x40] sm:$0xff] %v324_v31 }
  0xb0   : > { %362 = vst [vmem:[%s633_s14 + $0x70] sm:$0xff] %v342_v32 }
  0xb2   : > { %v309_v33 = vpop.f32.mrf.mxu0 }
  0xb3   : > { %351 = vst [vmem:[%s633_s14 + $0x18] sm:$0xff] %v309_v33 }
  0xb6   : > { %v327_v34 = vpop.f32.mrf.mxu2  ;;  %v345_v35 = vpop.f32.mrf.mxu3 }
  0xb7   : > { %357 = vst [vmem:[%s633_s14 + $0x48] sm:$0xff] %v327_v34  ;;  %365 = vmatpush.xpose.msra.mxu1 %v345_v35 }
  0xb8   : > { %363 = vst [vmem:[%s633_s14 + $0x78] sm:$0xff] %v345_v35 }
  0xba   : > { %v312_v36 = vpop.f32.mrf.mxu0 }
  0xbb   : > { %366 = vmatpush.xpose.msra.mxu1 %v342_v32  ;;  %352 = vst [vmem:[%s633_s14 + $0x20] sm:$0xff] %v312_v36 }
  0xbe   : > { %v330_v37 = vpop.f32.mrf.mxu2 }
  0xbf   : > { %358 = vst [vmem:[%s633_s14 + $0x50] sm:$0xff] %v330_v37  ;;  %367 = vmatpush.xpose.msra.mxu1 %v339_v29 }
  0xc2   : > { %v315_v38 = vpop.f32.mrf.mxu0 }
  0xc3   : > { %368 = vmatpush.xpose.msra.mxu1 %v336_v26  ;;  %353 = vst [vmem:[%s633_s14 + $0x28] sm:$0xff] %v315_v38 }
  0xc6   : > { %v333_v39 = vpop.f32.mrf.mxu2 }
  0xc7   : > { %359 = vst [vmem:[%s633_s14 + $0x58] sm:$0xff] %v333_v39  ;;  %369 = vmatpush.xpose.msra.mxu1 %v333_v39 }
  0xcb   : > { %370 = vmatpush.xpose.msra.mxu1 %v330_v37 }
  0xcf   : > { %371 = vmatpush.xpose.msra.mxu1 %v327_v34 }
  0xd3   : > { %372 = vmatpush.xpose.msra.mxu1 %v324_v31 }
  0xd7   : > { %373 = vmatpush.xpose.msra.mxu1 %v321_v28 }
  0xdb   : > { %374 = vmatpush.xpose.msra.mxu1 %v318_v25 }
  0xdf   : > { %375 = vmatpush.xpose.msra.mxu1 %v315_v38 }
  0xe3   : > { %376 = vmatpush.xpose.msra.mxu1 %v312_v36 }
  0xe7   : > { %377 = vmatpush.xpose.msra.mxu1 %v309_v33 }
  0xeb   : > { %378 = vmatpush.xpose.msra.mxu1 %v306_v30 }
  0xef   : > { %379 = vmatpush.xpose.msra.mxu1 %v303_v27 }
  0xf3   : > { %380 = vmatpush.xpose.msra.mxu1 %v300_v24 }
  0xf6   : > { %381 = vmatmul.f32.vlgmr.msra.gmra.mxu1 %v364_v40 }
 0x173   : > { %v382_v41 = vpop.f32.mrf.mxu1 }
 0x174   : > { %385 = vst [vmem:[%s209_s21] sm:$0x1] %v382_v41 }
 0x175 PF: > { %s15_s15 = sadd.s32 1, %s524_s15  }
 0x176   : > { %p12_p5 = scmp.ge.s32.totalorder %s15_s15, 4  }
 0x178   :  { %14 = sbr.rel (!%p12_p5) target bundleno = 1 (0x1), region = 74 }

// kernel: _gat_forward_core.3
= control target key start
LH: loop header
LB: loop body
LE: loop exit
PB: predicated region body
PF: predicated region fallthrough
CT: control target
= control target key end

     0   :  { %s1527_s15 = smov 0   ;;  %s2205_s0 = inlined_call_operand.vmem [shape: s8[256,256], index: 0, kind: input, shape index: {}]   ;;  %s2206_s1 = inlined_call_operand.vmem [shape: f32[256,128], index: 1, kind: input, shape index: {}]   ;;  %s2207_s2 = inlined_call_operand.vmem [shape: f32[1,256], index: 2, kind: input, shape index: {}]   ;;  %s2208_s3 = inlined_call_operand.vmem [shape: f32[128,1], index: 3, kind: input, shape index: {}]   ;;  %s2209_s4 = inlined_call_operand.vmem [shape: f32[256,128], index: 4, kind: output, shape index: {}]  }
   0x1 LB: > { %s1533_s16 = sadd.s32 4294967295, %s1499_s15   ;;  %p1279_p0 = scmp.ge.s32.totalorder %s1499_s15, 1  ;;  %s1499_s15 = sphi %s1527_s15, %s14_s15  }
   0x2   : > { %p164_p1 = scmp.lt.s32.totalorder %s1499_s15, 3 }
   0x4   : > { %p165_p2 = pnand %p1279_p0, %p164_p1 }
   0x5   : > { %s1285_s19 = sshll.u32 (!%p165_p2), %s1533_s16, 7  ;;  %s1280_s29 = sshll.u32 (!%p165_p2), %s1533_s16, 2 }
   0x6   : > { %168 = sbr.rel (%p165_p2) target bundleno = 768 (0x300), region = 36  ;;  %s1586_s26 = scalar_lea.vmem (!%p165_p2), %s2206_s1, %s1285_s19 }
   0x7   : > { %p192_p3 = scmp.lt.s32.totalorder (!%p165_p2), %s1280_s29, 7  ;;  %s1283_s28 = sshll.u32 (!%p165_p2), %s1533_s16, 4 }
   0x8   : > { %p2162_p4 = scmp.lt.s32.totalorder (!%p165_p2), %s1283_s28, 31 }
   0xb   : > { %v239_v0 = vld [vmem:[%s2208_s3 + $0x78] sm:$0xff]  ;;  %v238_v1 = vld [vmem:[%s2208_s3 + $0x70] sm:$0xff]  ;;  %v237_v2 = vld [vmem:[%s2208_s3 + $0x68] sm:$0xff]  ;;  %v1501_v25 = vmov 0   ;;  %s2238_s29 = smov (!%p192_p3, %s1280_s29), 7  ;;  %s2240_s28 = smov (!%p2162_p4, %s1283_s28), 31 }
   0xc   : > { %240 = vmatpush.msra.mxu0 %v239_v0  ;;  %1305 = vmatpush.msra.mxu3 %v239_v0  ;;  %v236_v3 = vld [vmem:[%s2208_s3 + $0x60] sm:$0xff]  ;;  %v235_v4 = vld [vmem:[%s2208_s3 + $0x58] sm:$0xff]  ;;  %v234_v5 = vld [vmem:[%s2208_s3 + $0x50] sm:$0xff]  ;;  %s1304_s30 = sshll.u32 %s2238_s29, 4  ;;  %s1284_s16 = sshll.u32 %s2240_s28, 3 }
   0xd   : > { %v233_v6 = vld [vmem:[%s2208_s3 + $0x48] sm:$0xff]  ;;  %v232_v7 = vld [vmem:[%s2208_s3 + $0x40] sm:$0xff]  ;;  %v231_v8 = vld [vmem:[%s2208_s3 + $0x38] sm:$0xff]  ;;  %1362 = vset.pattern.permute.xlu0 %v1501_v25  ;;  %1363 = vset.pattern.permute.xlu2 %v1501_v25  ;;  %s1614_s7 = scalar_lea.vmem %s2205_s0, %s1304_s30  ;;  %s2176_s6 = scalar_lea.vmem %s2209_s4, %s1284_s16 }
   0xe   : > { %241 = vmatpush.msra.mxu0 %v238_v1  ;;  %1306 = vmatpush.msra.mxu3 %v238_v1  ;;  %v230_v9 = vld [vmem:[%s2208_s3 + $0x30] sm:$0xff]  ;;  %v229_v10 = vld [vmem:[%s2208_s3 + $0x28] sm:$0xff]  ;;  %v228_v11 = vld [vmem:[%s2208_s3 + $0x20] sm:$0xff] }
   0xf   : > { %v227_v12 = vld [vmem:[%s2208_s3 + $0x18] sm:$0xff]  ;;  %v226_v13 = vld [vmem:[%s2208_s3 + $0x10] sm:$0xff]  ;;  %v225_v14 = vld [vmem:[%s2208_s3 + $0x8] sm:$0xff]  ;;  %1364 = vset.pattern.permute.xlu1 %v1501_v25 }
  0x10   : > { %242 = vmatpush.msra.mxu0 %v237_v2  ;;  %1307 = vmatpush.msra.mxu3 %v237_v2  ;;  %v224_v15 = vld [vmem:[%s2208_s3] sm:$0xff]  ;;  %v209_v18 = vld [vmem:[%s1586_s26 + $0x8] sm:$0xff]  ;;  %v210_v20 = vld [vmem:[%s1586_s26 + $0x10] sm:$0xff] }
  0x11   : > { %v208_v16 = vld [vmem:[%s1586_s26] sm:$0xff]  ;;  %v221_v19 = vld [vmem:[%s1586_s26 + $0x68] sm:$0xff]  ;;  %v222_v21 = vld [vmem:[%s1586_s26 + $0x70] sm:$0xff] }
  0x12   : > { %243 = vmatpush.msra.mxu0 %v236_v3  ;;  %1308 = vmatpush.msra.mxu3 %v236_v3  ;;  %v220_v17 = vld [vmem:[%s1586_s26 + $0x60] sm:$0xff]  ;;  %v211_v22 = vld [vmem:[%s1586_s26 + $0x18] sm:$0xff]  ;;  %v213_v26 = vld [vmem:[%s1586_s26 + $0x28] sm:$0xff] }
  0x13   : > { %v223_v23 = vld [vmem:[%s1586_s26 + $0x78] sm:$0xff]  ;;  %v212_v24 = vld [vmem:[%s1586_s26 + $0x20] sm:$0xff]  ;;  %v214_v27 = vld [vmem:[%s1586_s26 + $0x30] sm:$0xff] }
  0x14   : > { %244 = vmatpush.msra.mxu0 %v235_v4  ;;  %1309 = vmatpush.msra.mxu3 %v235_v4  ;;  %v215_v28 = vld [vmem:[%s1586_s26 + $0x38] sm:$0xff]  ;;  %v216_v29 = vld [vmem:[%s1586_s26 + $0x40] sm:$0xff]  ;;  %v217_v30 = vld [vmem:[%s1586_s26 + $0x48] sm:$0xff] }
  0x15   : > { %v218_v36 = vld [vmem:[%s1586_s26 + $0x50] sm:$0xff]  ;;  %v219_v38 = vld [vmem:[%s1586_s26 + $0x58] sm:$0xff]  ;;  %v519_v46 = vld [vmem:[%s1614_s7] sm:$0xff] }
  0x16   : > { %245 = vmatpush.msra.mxu0 %v234_v5  ;;  %1310 = vmatpush.msra.mxu3 %v234_v5  ;;  %v520_v47 = vld [vmem:[%s1614_s7 + $0x8] sm:$0xff]  ;;  %vm527_vm0 = vnez %v519_v46  ;;  %v525_v58 = vld [vmem:[%s1614_s7 + $0x30] sm:$0xff]  ;;  %v526_v59 = vld [vmem:[%s1614_s7 + $0x38] sm:$0xff] }
  0x17   : > { %vm528_vm1 = vnez %v520_v47  ;;  %v1619_v48 = vsel %vm527_vm0, 16843009, %v1501_v25  ;;  %v305_v61 = vld [vmem:[%s2207_s2] sm:$0x3]  ;;  %vm533_vm3 = vnez %v525_v58  ;;  %vm534_vm4 = vnez %v526_v59 }
  0x18   : > { %246 = vmatpush.msra.mxu0 %v233_v6  ;;  %1311 = vmatpush.msra.mxu3 %v233_v6  ;;  %v1622_v49 = vsel %vm528_vm1, 16843009, %v1501_v25  ;;  %v543_v50 = vunpack.c.0.s8 %v1619_v48  ;;  %v545_v54 = vunpack.c.1.s8 %v1619_v48  ;;  %v1634_v0 = vperm.slane %v305_v61, 0 }
  0x19   : > { %v544_v51 = vunpack.c.0.s8 %v1622_v49  ;;  %v546_v55 = vunpack.c.1.s8 %v1622_v49  ;;  %v1636_v1 = vperm.slane %v305_v61, 1  ;;  %v1643_v4 = vsel %vm533_vm3, 16843009, %v1501_v25 }
  0x1a   : > { %247 = vmatpush.msra.mxu0 %v232_v7  ;;  %1312 = vmatpush.msra.mxu3 %v232_v7  ;;  %v1646_v5 = vsel %vm534_vm4, 16843009, %v1501_v25  ;;  %v549_v46 = vunpack.c.3.s8 %v1619_v48  ;;  %v550_v47 = vunpack.c.3.s8 %v1622_v49 }
  0x1b   : > { %v575_v52 = vpack.c.b16 %v544_v51, %v543_v50  ;;  %v577_v56 = vpack.c.b16 %v546_v55, %v545_v54 }
  0x1c   : > { %248 = vmatpush.msra.mxu0 %v231_v8  ;;  %1313 = vmatpush.msra.mxu3 %v231_v8  ;;  %v569_v8 = vunpack.c.1.s8 %v1643_v4  ;;  %v581_v58 = vpack.c.b16 %v550_v47, %v549_v46 }
  0x1d   : > { %v576_v53 = vpack.c.b8 %v575_v52, %v575_v52  ;;  %v578_v60 = vpack.c.b8 %v577_v56, %v577_v56 }
  0x1e   : > { %249 = vmatpush.msra.mxu0 %v230_v9  ;;  %1314 = vmatpush.msra.mxu3 %v230_v9 }
  0x1f   : > { %vm607_vm2 = vnez %v576_v53  ;;  %vm608_vm5 = vnez %v578_v60 }
  0x20   : > { %250 = vmatpush.msra.mxu0 %v229_v10  ;;  %1315 = vmatpush.msra.mxu3 %v229_v10  ;;  %v623_v57 = vsel %vm607_vm2, 16843009, %v1501_v25  ;;  %v624_v9 = vsel %vm608_vm5, 16843009, %v1501_v25  ;;  %v547_v10 = vunpack.c.2.s8 %v1619_v48 }
  0x21   : > { %v639_v62 = vunpack.c.0.s8 %v623_v57  ;;  %v640_v63 = vunpack.c.1.s8 %v623_v57 }
  0x22   : > { %251 = vmatpush.msra.mxu0 %v228_v11  ;;  %1316 = vmatpush.msra.mxu3 %v228_v11  ;;  %v548_v11 = vunpack.c.2.s8 %v1622_v49 }
  0x23   : > { %vm1638_vm6 = vcmp.ne.s32.totalorder %v639_v62, 0  ;;  %vm672_vm7 = vcmp.ne.s32.totalorder %v640_v63, 0 }
  0x24   : > { %252 = vmatpush.msra.mxu0 %v227_v12  ;;  %1317 = vmatpush.msra.mxu3 %v227_v12  ;;  %v570_v12 = vunpack.c.1.s8 %v1646_v5 }
  0x26   : > { %253 = vmatpush.msra.mxu0 %v226_v13  ;;  %1318 = vmatpush.msra.mxu3 %v226_v13 }
  0x28   : > { %254 = vmatpush.msra.mxu0 %v225_v14  ;;  %1319 = vmatpush.msra.mxu3 %v225_v14 }
  0x2a   : > { %255 = vmatpush.msra.mxu0 %v224_v15  ;;  %1320 = vmatpush.msra.mxu3 %v224_v15 }
  0x2b   : > { %256 = vmatmul.f32.vlgmr.msra.gmra.mxu0 %v208_v16  ;;  %292 = vmatmul.f32.vlgmr.msra.gmra.mxu3 %v220_v17 }
  0x33   : > { %259 = vmatmul.f32.gmra.mxu0 %v209_v18  ;;  %295 = vmatmul.f32.gmra.mxu3 %v221_v19  ;;  %v641_v19 = vunpack.c.0.s8 %v624_v9 }
  0x35   : > { %vm673_vm10 = vcmp.ne.s32.totalorder %v641_v19, 0 }
  0x3b   : > { %262 = vmatmul.f32.gmra.mxu0 %v210_v20  ;;  %298 = vmatmul.f32.gmra.mxu3 %v222_v21  ;;  %v579_v20 = vpack.c.b16 %v548_v11, %v547_v10  ;;  %v582_v11 = vpack.c.b8 %v581_v58, %v581_v58 }
  0x43   : > { %265 = vmatmul.f32.gmra.mxu0 %v211_v22  ;;  %301 = vmatmul.f32.gmra.mxu3 %v223_v23  ;;  %v642_v22 = vunpack.c.1.s8 %v624_v9  ;;  %v601_v23 = vpack.c.b16 %v570_v12, %v569_v8 }
  0x45   : > { %vm674_vm13 = vcmp.ne.s32.totalorder %v642_v22, 0 }
  0x4b   : > { %268 = vmatmul.f32.gmra.mxu0 %v212_v24  ;;  %v521_v24 = vld [vmem:[%s1614_s7 + $0x10] sm:$0xff] }
  0x4c   : > { %vm529_vm11 = vnez %v521_v24 }
  0x53   : > { %271 = vmatmul.f32.gmra.mxu0 %v213_v26  ;;  %v522_v26 = vld [vmem:[%s1614_s7 + $0x18] sm:$0xff] }
  0x54   : > { %vm530_vm12 = vnez %v522_v26 }
  0x5b   : > { %274 = vmatmul.f32.gmra.mxu0 %v214_v27 }
  0x63   : > { %277 = vmatmul.f32.gmra.mxu0 %v215_v28 }
  0x6b   : > { %280 = vmatmul.f32.gmra.mxu0 %v216_v29 }
  0x73   : > { %283 = vmatmul.f32.gmra.mxu0 %v217_v30  ;;  %v580_v30 = vpack.c.b8 %v579_v20, %v579_v20 }
  0x75   : > { %vm609_vm0 = vnez %v580_v30 }
  0x7b   : > { %286 = vmatmul.f32.gmra.mxu0 %v218_v36  ;;  %v537_v36 = vsel %vm529_vm11, 16843009, %v1501_v25 }
  0x7c   : > { %v555_v54 = vunpack.c.2.s8 %v537_v36  ;;  %v553_v59 = vunpack.c.1.s8 %v537_v36  ;;  %v557_v3 = vunpack.c.3.s8 %v537_v36 }
  0x83   : > { %289 = vmatmul.f32.gmra.mxu0 %v219_v38 }
  0xa8   : > { %v257_v31 = vpop.f32.mrf.mxu0 }
  0xa9   : > { %308 = vperm.xlu0 %1362, %v257_v31  }
  0xae   : > { %v293_v32 = vpop.f32.mrf.mxu3 }
  0xaf   : > { %368 = vperm.xlu2 %1363, %v293_v32  }
  0xb0   : > { %v260_v33 = vpop.f32.mrf.mxu0 }
  0xb1   : > { %313 = vperm.xlu0 %1362, %v260_v33   ;;  %v602_v33 = vpack.c.b8 %v601_v23, %v601_v23 }
  0xb3   : > { %vm620_vm1 = vnez %v602_v33 }
  0xb6   : > { %v296_v34 = vpop.f32.mrf.mxu3 }
  0xb7   : > { %373 = vperm.xlu1 %1364, %v296_v34  }
  0xb8   : > { %v263_v35 = vpop.f32.mrf.mxu0 }
  0xbe   : > { %v299_v39 = vpop.f32.mrf.mxu3 }
  0xbf   : > { %318 = vperm.xlu1 %1364, %v263_v35  }
  0xc0   : > { %v266_v37 = vpop.f32.mrf.mxu0 }
  0xc6   : > { %v302_v42 = vpop.f32.mrf.mxu3 }
  0xc7   : > { %378 = vperm.xlu1 %1364, %v299_v39  }
  0xc8   : > { %v269_v40 = vpop.f32.mrf.mxu0 }
  0xc9   : > { %328 = vperm.xlu2 %1363, %v269_v40   ;;  %v538_v40 = vsel %vm530_vm12, 16843009, %v1501_v25 }
  0xca   : > { %v556_v55 = vunpack.c.2.s8 %v538_v40  ;;  %v554_v60 = vunpack.c.1.s8 %v538_v40 }
  0xcc   : > { %v1683_v63 = vpack.c.b16 %v556_v55, %v555_v54  ;;  %v585_v12 = vpack.c.b16 %v554_v60, %v553_v59 }
  0xcf   : > { %323 = vperm.xlu1 %1364, %v266_v37  }
  0xd0   : > { %v272_v41 = vpop.f32.mrf.mxu0 }
  0xd1   : > { %333 = vperm.xlu0 %1362, %v272_v41  }
  0xd7   : > { %383 = vperm.xlu1 %1364, %v302_v42   ;;  %v625_v42 = vsel %vm609_vm0, 16843009, %v1501_v25 }
  0xd8   : > { %v275_v43 = vpop.f32.mrf.mxu0  ;;  %v643_v50 = vunpack.c.0.s8 %v625_v42  ;;  %v644_v51 = vunpack.c.1.s8 %v625_v42 }
  0xd9   : > { %338 = vperm.xlu0 %1362, %v275_v43   ;;  %v551_v43 = vunpack.c.0.s8 %v537_v36 }
  0xda   : > { %vm1685_vm2 = vcmp.ne.s32.totalorder %v643_v50, 0  ;;  %vm1689_vm3 = vcmp.ne.s32.totalorder %v644_v51, 0 }
  0xe0   : > { %v278_v44 = vpop.f32.mrf.mxu0 }
  0xe1   : > { %343 = vperm.xlu1 %1364, %v278_v44   ;;  %v552_v44 = vunpack.c.0.s8 %v538_v40 }
  0xe3   : > { %v583_v53 = vpack.c.b16 %v552_v44, %v551_v43  ;;  %v567_v44 = vunpack.c.0.s8 %v1643_v4 }
  0xe5   : > { %v584_v23 = vpack.c.b8 %v583_v53, %v583_v53 }
  0xe7   : > { %vm611_vm11 = vnez %v584_v23 }
  0xe8   : > { %v281_v45 = vpop.f32.mrf.mxu0  ;;  %v627_v36 = vsel %vm611_vm11, 16843009, %v1501_v25 }
  0xe9   : > { %348 = vperm.xlu2 %1363, %v281_v45   ;;  %v636_v45 = vsel %vm620_vm1, 16843009, %v1501_v25  ;;  %v647_v50 = vunpack.c.0.s8 %v627_v36  ;;  %v648_v51 = vunpack.c.1.s8 %v627_v36  ;;  %v573_v36 = vunpack.c.3.s8 %v1643_v4 }
  0xea   : > { %v665_v52 = vunpack.c.0.s8 %v636_v45  ;;  %v666_v10 = vunpack.c.1.s8 %v636_v45  ;;  %v568_v45 = vunpack.c.0.s8 %v1646_v5 }
  0xf0   : > { %v284_v26 = vpop.f32.mrf.mxu0 }
 0x11b   : > { %v309_v2 = vpop.permute.xlu0 %308 }
 0x11c   : > { %v391_v6 = vadd.f32 %v1634_v0, %v309_v2  ;;  %v392_v7 = vadd.f32 %v1636_v1, %v309_v2 }
 0x11e   : > { %v455_v13 = vmul.f32 0.2, %v391_v6  ;;  %v456_v14 = vmul.f32 0.2, %v392_v7  ;;  %vm423_vm8 = vcmp.gt.f32.partialorder %v391_v6, 0.0  ;;  %vm424_vm9 = vcmp.gt.f32.partialorder %v392_v7, 0.0 }
 0x120   : > { %v487_v15 = vsel %vm423_vm8, %v391_v6, %v455_v13  ;;  %v488_v16 = vsel %vm424_vm9, %v392_v7, %v456_v14  ;;  %v558_v6 = vunpack.c.3.s8 %v538_v40  ;;  %v1693_v7 = vpop.permute.xlu2 %368  ;;  %vm610_vm8 = vnez %v582_v11 }
 0x121   : > { %v1657_v17 = vsel %vm1638_vm6, %v487_v15, -1e+12  ;;  %v1659_v18 = vsel %vm672_vm7, %v488_v16, -1e+12  ;;  %vm697_vm9 = vcmp.ne.s32.totalorder %v665_v52, 0 }
 0x122   : > { %v735_v21 = vmax.f32 %v1657_v17, %v1659_v18  ;;  %v1695_v13 = vpack.c.b16 %v558_v6, %v557_v3 }
 0x123   : > { %v314_v27 = vpop.permute.xlu0 %313 }
 0x124   : > { %v393_v28 = vadd.f32 %v1634_v0, %v314_v27  ;;  %v394_v29 = vadd.f32 %v1636_v1, %v314_v27  ;;  %736 = vmax.xlane.f32.xlu2 %v735_v21  ;;  %v586_v27 = vpack.c.b8 %v585_v12, %v585_v12 }
 0x126   : > { %v457_v31 = vmul.f32 0.2, %v393_v28  ;;  %v458_v32 = vmul.f32 0.2, %v394_v29  ;;  %vm425_vm14 = vcmp.gt.f32.partialorder %v393_v28, 0.0  ;;  %vm426_vm15 = vcmp.gt.f32.partialorder %v394_v29, 0.0 }
 0x127   : > { %vm612_vm12 = vnez %v586_v27  ;;  %v572_v27 = vunpack.c.2.s8 %v1646_v5 }
 0x128   : > { %v489_v34 = vsel %vm425_vm14, %v393_v28, %v457_v31  ;;  %v490_v35 = vsel %vm426_vm15, %v394_v29, %v458_v32  ;;  %v329_v30 = vpop.permute.xlu2 %328  ;;  %v626_v31 = vsel %vm610_vm8, 16843009, %v1501_v25  ;;  %v628_v40 = vsel %vm612_vm12, 16843009, %v1501_v25 }
 0x129   : > { %v374_v37 = vpop.permute.xlu1 %373  ;;  %v1668_v38 = vsel %vm673_vm10, %v489_v34, -1e+12  ;;  %v1670_v39 = vsel %vm674_vm13, %v490_v35, -1e+12  ;;  %vm698_vm10 = vcmp.ne.s32.totalorder %v666_v10, 0  ;;  %v399_v34 = vadd.f32 %v1634_v0, %v329_v30 }
 0x12a   : > { %v738_v41 = vmax.f32 %v1668_v38, %v1670_v39  ;;  %v417_v56 = vadd.f32 %v1634_v0, %v374_v37  ;;  %v418_v61 = vadd.f32 %v1636_v1, %v374_v37  ;;  %v645_v35 = vunpack.c.0.s8 %v626_v31 }
 0x12b   : > { %v646_v43 = vunpack.c.1.s8 %v626_v31  ;;  %v463_v52 = vmul.f32 0.2, %v399_v34  ;;  %v649_v54 = vunpack.c.0.s8 %v628_v40  ;;  %v650_v55 = vunpack.c.1.s8 %v628_v40  ;;  %v523_v40 = vld [vmem:[%s1614_s7 + $0x20] sm:$0xff] }
 0x12c   : > { %739 = vmax.xlane.f32.xlu0 %v738_v41  ;;  %v481_v14 = vmul.f32 0.2, %v417_v56  ;;  %v482_v15 = vmul.f32 0.2, %v418_v61  ;;  %vm449_vm6 = vcmp.gt.f32.partialorder %v417_v56, 0.0  ;;  %vm450_vm7 = vcmp.gt.f32.partialorder %v418_v61, 0.0 }
 0x12d   : > { %v400_v41 = vadd.f32 %v1636_v1, %v329_v30  ;;  %vm677_vm13 = vcmp.ne.s32.totalorder %v645_v35, 0  ;;  %vm678_vm0 = vcmp.ne.s32.totalorder %v646_v43, 0  ;;  %vm681_vm1 = vcmp.ne.s32.totalorder %v649_v54, 0 }
 0x12e   : > { %v513_v28 = vsel %vm449_vm6, %v417_v56, %v481_v14  ;;  %v514_v29 = vsel %vm450_vm7, %v418_v61, %v482_v15  ;;  %v599_v10 = vpack.c.b16 %v568_v45, %v567_v44  ;;  %vm679_vm7 = vcmp.ne.s32.totalorder %v647_v50, 0 }
 0x12f   : > { %v1710_v32 = vsel %vm697_vm9, %v513_v28, -1e+12  ;;  %v1712_v33 = vsel %vm698_vm10, %v514_v29, -1e+12  ;;  %v464_v60 = vmul.f32 0.2, %v400_v41  ;;  %v415_v30 = vadd.f32 %v1634_v0, %v1693_v7 }
 0x130   : > { %v774_v37 = vmax.f32 %v1710_v32, %v1712_v33  ;;  %vm432_vm6 = vcmp.gt.f32.partialorder %v400_v41, 0.0  ;;  %vm680_vm8 = vcmp.ne.s32.totalorder %v648_v51, 0  ;;  %vm531_vm11 = vnez %v523_v40 }
 0x131   : > { %v319_v57 = vpop.permute.xlu1 %318  ;;  %v479_v43 = vmul.f32 0.2, %v415_v30  ;;  %vm447_vm10 = vcmp.gt.f32.partialorder %v415_v30, 0.0  ;;  %v1764_v50 = vsel %vm531_vm11, 16843009, %v1501_v25 }
 0x132   : > { %v395_v62 = vadd.f32 %v1634_v0, %v319_v57  ;;  %v396_v48 = vadd.f32 %v1636_v1, %v319_v57 }
 0x134   : > { %v459_v8 = vmul.f32 0.2, %v395_v62  ;;  %v460_v9 = vmul.f32 0.2, %v396_v48  ;;  %vm427_vm4 = vcmp.gt.f32.partialorder %v395_v62, 0.0  ;;  %vm428_vm5 = vcmp.gt.f32.partialorder %v396_v48, 0.0 }
 0x136   : > { %v491_v16 = vsel %vm427_vm4, %v395_v62, %v459_v8  ;;  %v492_v19 = vsel %vm428_vm5, %v396_v48, %v460_v9 }
 0x137   : > { %v1699_v20 = vsel %vm1685_vm2, %v491_v16, -1e+12  ;;  %v1703_v21 = vsel %vm1689_vm3, %v492_v19, -1e+12  ;;  %vm682_vm2 = vcmp.ne.s32.totalorder %v650_v55, 0  ;;  %vm431_vm3 = vcmp.gt.f32.partialorder %v399_v34, 0.0 }
 0x138   : > { %v741_v22 = vmax.f32 %v1699_v20, %v1703_v21  ;;  %v495_v15 = vsel %vm431_vm3, %v399_v34, %v463_v52  ;;  %v496_v16 = vsel %vm432_vm6, %v400_v41, %v464_v60  ;;  %v600_v19 = vpack.c.b8 %v599_v10, %v599_v10  ;;  %v524_v41 = vld [vmem:[%s1614_s7 + $0x28] sm:$0xff] }
 0x139   : > { %v1707_v24 = vpop.permute.xlu1 %378  ;;  %v1740_v23 = vsel %vm680_vm8, %v496_v16, -1e+12  ;;  %v416_v34 = vadd.f32 %v1636_v1, %v1693_v7  ;;  %vm532_vm12 = vnez %v524_v41  ;;  %v1818_v16 = vld [vmem:[%s2206_s1 + $0xe0] sm:$0xff] }
 0x13a   : > { %742 = vmax.xlane.f32.xlu1 %v741_v22  ;;  %v1738_v22 = vsel %vm679_vm7, %v495_v15, -1e+12  ;;  %vm619_vm9 = vnez %v600_v19  ;;  %v1767_v51 = vsel %vm532_vm12, 16843009, %v1501_v25  ;;  %v420_v52 = vadd.f32 %v1636_v1, %v1707_v24  ;;  %v939_v15 = vld [vmem:[%s2206_s1 + $0x60] sm:$0xff] }
 0x13b   : > { %v747_v28 = vmax.f32 %v1738_v22, %v1740_v23  ;;  %v635_v31 = vsel %vm619_vm9, 16843009, %v1501_v25  ;;  %v480_v45 = vmul.f32 0.2, %v416_v34 }
 0x13c   : > { %353 = vperm.xlu2 %1363, %v284_v26   ;;  %v571_v26 = vunpack.c.2.s8 %v1643_v4  ;;  %v664_v44 = vunpack.c.1.s8 %v635_v31  ;;  %v419_v4 = vadd.f32 %v1634_v0, %v1707_v24  ;;  %v941_v24 = vld [vmem:[%s2206_s1 + $0x70] sm:$0xff] }
 0x13e   : > { %v603_v29 = vpack.c.b16 %v572_v27, %v571_v26  ;;  %v935_v26 = vld [vmem:[%s2206_s1 + $0x40] sm:$0xff] }
 0x140   : > { %v604_v35 = vpack.c.b8 %v603_v29, %v603_v29 }
 0x141   : > { %v324_v42 = vpop.permute.xlu1 %323 }
 0x142   : > { %v397_v46 = vadd.f32 %v1634_v0, %v324_v42  ;;  %v398_v47 = vadd.f32 %v1636_v1, %v324_v42  ;;  %775 = vmax.xlane.f32.xlu1 %v774_v37  ;;  %v574_v37 = vunpack.c.3.s8 %v1646_v5  ;;  %v663_v42 = vunpack.c.0.s8 %v635_v31 }
 0x143   : > { %v334_v53 = vpop.permute.xlu0 %333  ;;  %v511_v5 = vsel %vm447_vm10, %v415_v30, %v479_v43  ;;  %v938_v30 = vld [vmem:[%s2206_s1 + $0x58] sm:$0xff]  ;;  %v937_v43 = vld [vmem:[%s2206_s1 + $0x50] sm:$0xff] }
 0x144   : > { %v461_v56 = vmul.f32 0.2, %v397_v46  ;;  %v462_v57 = vmul.f32 0.2, %v398_v47  ;;  %v401_v58 = vadd.f32 %v1634_v0, %v334_v53  ;;  %v402_v59 = vadd.f32 %v1636_v1, %v334_v53 }
 0x145   : > { %vm429_vm14 = vcmp.gt.f32.partialorder %v397_v46, 0.0  ;;  %vm430_vm15 = vcmp.gt.f32.partialorder %v398_v47, 0.0 }
 0x146   : > { %v465_v61 = vmul.f32 0.2, %v401_v58  ;;  %v466_v62 = vmul.f32 0.2, %v402_v59  ;;  %v493_v48 = vsel %vm429_vm14, %v397_v46, %v461_v56  ;;  %v494_v49 = vsel %vm430_vm15, %v398_v47, %v462_v57  ;;  %v1755_v46 = vpop.f32.mrf.mxu0  ;;  %v942_v56 = vld [vmem:[%s2206_s1 + $0x78] sm:$0xff] }
 0x147   : > { %v1726_v2 = vsel %vm677_vm13, %v493_v48, -1e+12  ;;  %v1728_v3 = vsel %vm678_vm0, %v494_v49, -1e+12  ;;  %vm433_vm4 = vcmp.gt.f32.partialorder %v401_v58, 0.0  ;;  %vm434_vm5 = vcmp.gt.f32.partialorder %v402_v59, 0.0  ;;  %959 = vmatpush.msra.mxu1 %v942_v56  ;;  %1321 = vmatpush.msrb.mxu3 %v942_v56 }
 0x148   : > { %v744_v6 = vmax.f32 %v1726_v2, %v1728_v3  ;;  %v497_v8 = vsel %vm433_vm4, %v401_v58, %v465_v61  ;;  %v498_v9 = vsel %vm434_vm5, %v402_v59, %v466_v62  ;;  %vm448_vm13 = vcmp.gt.f32.partialorder %v416_v34, 0.0  ;;  %v1782_v57 = vld [vmem:[%s2206_s1 + $0xf8] sm:$0xff]  ;;  %v1791_v59 = vld [vmem:[%s2206_s1 + $0xf0] sm:$0xff]  ;;  %v940_v48 = vld [vmem:[%s2206_s1 + $0x68] sm:$0xff] }
 0x149   : > { %v1732_v11 = vsel %vm681_vm1, %v497_v8, -1e+12  ;;  %v1734_v12 = vsel %vm682_vm2, %v498_v9, -1e+12  ;;  %vm621_vm14 = vnez %v604_v35  ;;  %v605_v47 = vpack.c.b16 %v574_v37, %v573_v36  ;;  %1024 = vmatpush.msra.mxu2 %v1782_v57  ;;  %v1805_v49 = vld [vmem:[%s2206_s1 + $0xe8] sm:$0xff]  ;;  %960 = vmatpush.msra.mxu1 %v941_v24  ;;  %v384_v19 = vpop.permute.xlu1 %383  ;;  %v1842_v36 = vld [vmem:[%s2206_s1 + $0xd8] sm:$0xff] }
 0x14a   : > { %745 = vmax.xlane.f32.xlu0 %v744_v6  ;;  %v750_v14 = vmax.f32 %v1732_v11, %v1734_v12  ;;  %vm1757_vm15 = vcmp.ne.s32.totalorder %v663_v42, 0  ;;  %v512_v53 = vsel %vm448_vm13, %v416_v34, %v480_v45  ;;  %vm1771_vm0 = vcmp.ne.s32.totalorder %v664_v44, 0  ;;  %1322 = vmatpush.msrb.mxu3 %v941_v24  ;;  %v1856_v44 = vld [vmem:[%s2206_s1 + $0xd0] sm:$0xff] }
 0x14b   : > { %v637_v55 = vsel %vm621_vm14, 16843009, %v1501_v25  ;;  %v606_v58 = vpack.c.b8 %v605_v47, %v605_v47  ;;  %v1795_v60 = vsel %vm1757_vm15, %v511_v5, -1e+12  ;;  %v559_v61 = vunpack.c.0.s8 %v1764_v50  ;;  %1025 = vmatpush.msra.mxu2 %v1791_v59  ;;  %961 = vmatpush.msra.mxu1 %v940_v48 }
 0x14c   : > { %751 = vmax.xlane.f32.xlu1 %v750_v14  ;;  %v560_v62 = vunpack.c.0.s8 %v1767_v51  ;;  %v483_v6 = vmul.f32 0.2, %v419_v4  ;;  %v1809_v8 = vsel %vm1771_vm0, %v512_v53, -1e+12  ;;  %v667_v9 = vunpack.c.0.s8 %v637_v55  ;;  %1323 = vmatpush.msrb.mxu3 %v940_v48 }
 0x14d   : > { %v668_v10 = vunpack.c.1.s8 %v637_v55  ;;  %v484_v14 = vmul.f32 0.2, %v420_v52  ;;  %vm451_vm1 = vcmp.gt.f32.partialorder %v419_v4, 0.0  ;;  %vm452_vm2 = vcmp.gt.f32.partialorder %v420_v52, 0.0  ;;  %1026 = vmatpush.msra.mxu2 %v1805_v49  ;;  %962 = vmatpush.msra.mxu1 %v939_v15 }
 0x14e   : > { %vm1820_vm3 = vnez %v606_v58  ;;  %v290_v27 = vpop.f32.mrf.mxu0  ;;  %v591_v29 = vpack.c.b16 %v560_v62, %v559_v61  ;;  %v515_v31 = vsel %vm451_vm1, %v419_v4, %v483_v6  ;;  %vm1830_vm4 = vcmp.ne.s32.totalorder %v667_v9, 0  ;;  %1324 = vmatpush.msrb.mxu3 %v939_v15  ;;  %v936_v6 = vld [vmem:[%s2206_s1 + $0x48] sm:$0xff] }
 0x14f   : > { %vm1834_vm5 = vcmp.ne.s32.totalorder %v668_v10, 0  ;;  %1027 = vmatpush.msra.mxu2 %v1818_v16  ;;  %v421_v37 = vadd.f32 %v1634_v0, %v384_v19  ;;  %v422_v40 = vadd.f32 %v1636_v1, %v384_v19  ;;  %v516_v41 = vsel %vm452_vm2, %v420_v52, %v484_v14  ;;  %963 = vmatpush.msra.mxu1 %v938_v30  ;;  %v1884_v9 = vld [vmem:[%s2206_s1 + $0xc8] sm:$0xff] }
 0x150   : > { %v638_v42 = vsel %vm1820_vm3, 16843009, %v1501_v25  ;;  %v592_v45 = vpack.c.b8 %v591_v29, %v591_v29  ;;  %v1862_v47 = vsel %vm1830_vm4, %v515_v31, -1e+12  ;;  %v1866_v7 = vsel %vm1834_vm5, %v516_v41, -1e+12  ;;  %1325 = vmatpush.msrb.mxu3 %v938_v30 }
 0x151   : > { %1028 = vmatpush.msra.mxu2 %v1842_v36  ;;  %v669_v4 = vunpack.c.0.s8 %v638_v42  ;;  %v670_v5 = vunpack.c.1.s8 %v638_v42  ;;  %964 = vmatpush.msra.mxu1 %v937_v43  ;;  %v485_v52 = vmul.f32 0.2, %v421_v37  ;;  %v486_v53 = vmul.f32 0.2, %v422_v40  ;;  %v1904_v30 = vld [vmem:[%s2206_s1 + $0xb8] sm:$0xff]  ;;  %v933_v31 = vld [vmem:[%s2206_s1 + $0x30] sm:$0xff] }
 0x152   : > { %748 = vmax.xlane.f32.xlu0 %v747_v28  ;;  %v771_v28 = vmax.f32 %v1795_v60, %v1809_v8  ;;  %vm453_vm6 = vcmp.gt.f32.partialorder %v421_v37, 0.0  ;;  %vm454_vm7 = vcmp.gt.f32.partialorder %v422_v40, 0.0  ;;  %1326 = vmatpush.msrb.mxu3 %v937_v43  ;;  %v777_v54 = vmax.f32 %v1862_v47, %v1866_v7 }
 0x153   : > { %1029 = vmatpush.msra.mxu2 %v1856_v44  ;;  %vm615_vm8 = vnez %v592_v45  ;;  %vm701_vm9 = vcmp.ne.s32.totalorder %v669_v4, 0  ;;  %vm702_vm10 = vcmp.ne.s32.totalorder %v670_v5, 0  ;;  %v517_v24 = vsel %vm453_vm6, %v421_v37, %v485_v52  ;;  %965 = vmatpush.msra.mxu1 %v936_v6  ;;  %v1912_v37 = vld [vmem:[%s2206_s1 + $0xb0] sm:$0xff]  ;;  %v339_v4 = vpop.permute.xlu0 %338  ;;  %v932_v5 = vld [vmem:[%s2206_s1 + $0x28] sm:$0xff] }
 0x154   : > { %v518_v58 = vsel %vm454_vm7, %v422_v40, %v486_v53  ;;  %v631_v61 = vsel %vm615_vm8, 16843009, %v1501_v25  ;;  %v1874_v62 = vsel %vm701_vm9, %v517_v24, -1e+12  ;;  %1327 = vmatpush.msrb.mxu3 %v936_v6  ;;  %v588_v42 = vpack.c.b8 %v1683_v63, %v1683_v63  ;;  %v1932_v52 = vld [vmem:[%s2206_s1 + $0xa8] sm:$0xff]  ;;  %v344_v53 = vpop.permute.xlu1 %343  ;;  %v931_v63 = vld [vmem:[%s2206_s1 + $0x20] sm:$0xff] }
 0x155   : > { %v1876_v48 = vsel %vm702_vm10, %v518_v58, -1e+12  ;;  %v655_v15 = vunpack.c.0.s8 %v631_v61  ;;  %v656_v19 = vunpack.c.1.s8 %v631_v61  ;;  %1030 = vmatpush.msra.mxu2 %v1884_v9  ;;  %966 = vmatpush.msra.mxu1 %v935_v26  ;;  %v590_v43 = vpack.c.b8 %v1695_v13, %v1695_v13  ;;  %v1940_v13 = vld [vmem:[%s2206_s1 + $0xa0] sm:$0xff]  ;;  %v929_v61 = vld [vmem:[%s2206_s1 + $0x10] sm:$0xff] }
 0x156   : > { %v780_v29 = vmax.f32 %v1874_v62, %v1876_v48  ;;  %1328 = vmatpush.msrb.mxu3 %v935_v26  ;;  %vm613_vm15 = vnez %v588_v42  ;;  %v406_v24 = vadd.f32 %v1636_v1, %v344_v53  ;;  %v404_v6 = vadd.f32 %v1636_v1, %v339_v4 }
 0x157   : > { %vm687_vm13 = vcmp.ne.s32.totalorder %v655_v15, 0  ;;  %vm688_vm14 = vcmp.ne.s32.totalorder %v656_v19, 0  ;;  %vm614_vm0 = vnez %v590_v43  ;;  %v629_v58 = vsel %vm613_vm15, 16843009, %v1501_v25 }
 0x158   : > { %v651_v19 = vunpack.c.0.s8 %v629_v58  ;;  %v468_v42 = vmul.f32 0.2, %v404_v6  ;;  %vm438_vm2 = vcmp.gt.f32.partialorder %v406_v24, 0.0  ;;  %v652_v43 = vunpack.c.1.s8 %v629_v58 }
 0x159   : > { %vm436_vm4 = vcmp.gt.f32.partialorder %v404_v6, 0.0 }
 0x15a   : > { %vm683_vm7 = vcmp.ne.s32.totalorder %v651_v19, 0  ;;  %vm684_vm8 = vcmp.ne.s32.totalorder %v652_v43, 0 }
 0x165   : > { %772 = vmax.xlane.f32.xlu2 %v771_v28  ;;  %363 = vperm.xlu1 %1364, %v290_v27   ;;  %v1893_v27 = vld [vmem:[%s2206_s1 + $0xc0] sm:$0xff]  ;;  %v934_v28 = vld [vmem:[%s2206_s1 + $0x38] sm:$0xff] }
 0x166   : > { %358 = vperm.xlu0 %1362, %v1755_v46   ;;  %v349_v46 = vpop.permute.xlu2 %348  ;;  %1031 = vmatpush.msra.mxu2 %v1893_v27 }
 0x167   : > { %v407_v55 = vadd.f32 %v1634_v0, %v349_v46  ;;  %v408_v56 = vadd.f32 %v1636_v1, %v349_v46  ;;  %967 = vmatpush.msra.mxu1 %v934_v28  ;;  %1329 = vmatpush.msrb.mxu3 %v934_v28  ;;  %v930_v46 = vld [vmem:[%s2206_s1 + $0x18] sm:$0xff]  ;;  %v470_v28 = vmul.f32 0.2, %v406_v24 }
 0x168   : > { %1032 = vmatpush.msra.mxu2 %v1904_v30 }
 0x169   : > { %v471_v10 = vmul.f32 0.2, %v407_v55  ;;  %v472_v14 = vmul.f32 0.2, %v408_v56  ;;  %vm439_vm11 = vcmp.gt.f32.partialorder %v407_v55, 0.0  ;;  %vm440_vm12 = vcmp.gt.f32.partialorder %v408_v56, 0.0  ;;  %968 = vmatpush.msra.mxu1 %v933_v31  ;;  %1330 = vmatpush.msrb.mxu3 %v933_v31 }
 0x16a   : > { %1033 = vmatpush.msra.mxu2 %v1912_v37 }
 0x16b   : > { %v503_v34 = vsel %vm439_vm11, %v407_v55, %v471_v10  ;;  %v504_v35 = vsel %vm440_vm12, %v408_v56, %v472_v14  ;;  %969 = vmatpush.msra.mxu1 %v932_v5  ;;  %1331 = vmatpush.msrb.mxu3 %v932_v5  ;;  %v1950_v55 = vld [vmem:[%s2206_s1 + $0x98] sm:$0xff]  ;;  %v405_v56 = vadd.f32 %v1634_v0, %v344_v53  ;;  %v630_v10 = vsel %vm614_vm0, 16843009, %v1501_v25  ;;  %v1964_v14 = vld [vmem:[%s2206_s1 + $0x90] sm:$0xff] }
 0x16c   : > { %v1915_v40 = vsel %vm687_vm13, %v503_v34, -1e+12  ;;  %v1917_v41 = vsel %vm688_vm14, %v504_v35, -1e+12  ;;  %1034 = vmatpush.msra.mxu2 %v1932_v52  ;;  %v654_v31 = vunpack.c.1.s8 %v630_v10  ;;  %v928_v34 = vld [vmem:[%s2206_s1 + $0x8] sm:$0xff]  ;;  %v502_v53 = vsel %vm438_vm2, %v406_v24, %v470_v28 }
 0x16d   : > { %778 = vmax.xlane.f32.xlu2 %v777_v54  ;;  %v759_v45 = vmax.f32 %v1915_v40, %v1917_v41  ;;  %v403_v54 = vadd.f32 %v1634_v0, %v339_v4  ;;  %970 = vmatpush.msra.mxu1 %v931_v63  ;;  %v469_v26 = vmul.f32 0.2, %v405_v56  ;;  %v1974_v35 = vld [vmem:[%s2206_s1 + $0x88] sm:$0xff]  ;;  %vm437_vm1 = vcmp.gt.f32.partialorder %v405_v56, 0.0  ;;  %v1982_v4 = vld [vmem:[%s2206_s1 + $0x80] sm:$0xff] }
 0x16e   : > { %1035 = vmatpush.msra.mxu2 %v1940_v13  ;;  %1332 = vmatpush.msrb.mxu3 %v931_v63  ;;  %vm686_vm6 = vcmp.ne.s32.totalorder %v654_v31, 0 }
 0x16f   : > { %971 = vmatpush.msra.mxu1 %v930_v46  ;;  %v467_v15 = vmul.f32 0.2, %v403_v54  ;;  %vm435_vm3 = vcmp.gt.f32.partialorder %v403_v54, 0.0  ;;  %v501_v5 = vsel %vm437_vm1, %v405_v56, %v469_v26  ;;  %v562_v56 = vunpack.c.1.s8 %v1767_v51 }
 0x170   : > { %1036 = vmatpush.msra.mxu2 %v1950_v55  ;;  %1333 = vmatpush.msrb.mxu3 %v930_v46  ;;  %v500_v46 = vsel %vm436_vm4, %v404_v6, %v468_v42 }
 0x171   : > { %972 = vmatpush.msra.mxu1 %v929_v61  ;;  %v499_v63 = vsel %vm435_vm3, %v403_v54, %v467_v15  ;;  %v1996_v26 = vsel %vm684_vm8, %v500_v46, -1e+12 }
 0x172   : > { %1037 = vmatpush.msra.mxu2 %v1964_v14  ;;  %1334 = vmatpush.msrb.mxu3 %v929_v61  ;;  %v1989_v61 = vsel %vm686_vm6, %v502_v53, -1e+12  ;;  %v1994_v24 = vsel %vm683_vm7, %v499_v63, -1e+12 }
 0x173   : > { %973 = vmatpush.msra.mxu1 %v928_v34 }
 0x174   : > { %1038 = vmatpush.msra.mxu2 %v1974_v35  ;;  %1335 = vmatpush.msrb.mxu3 %v928_v34 }
 0x175   : > { %781 = vmax.xlane.f32.xlu2 %v780_v29  ;;  %v653_v29 = vunpack.c.0.s8 %v630_v10  ;;  %v561_v10 = vunpack.c.1.s8 %v1764_v50 }
 0x176   : > { %1039 = vmatpush.msra.mxu2 %v1982_v4 }
 0x177   : > { %vm685_vm5 = vcmp.ne.s32.totalorder %v653_v29, 0  ;;  %v593_v6 = vpack.c.b16 %v562_v56, %v561_v10 }
 0x178   : > { %v1987_v58 = vsel %vm685_vm5, %v501_v5, -1e+12 }
 0x179   : > { %v756_v54 = vmax.f32 %v1987_v58, %v1989_v61 }
 0x17d   : > { %760 = vmax.xlane.f32.xlu2 %v759_v45  ;;  %v927_v45 = vld [vmem:[%s2206_s1] sm:$0xff] }
 0x17e   : > { %974 = vmatpush.msra.mxu1 %v927_v45  ;;  %1336 = vmatpush.msrb.mxu3 %v927_v45 }
 0x180   : > { %1337 = vmatpush.msra.mxu3 %v1782_v57  ;;  %v753_v57 = vmax.f32 %v1994_v24, %v1996_v26 }
 0x182   : > { %1338 = vmatpush.msra.mxu3 %v1791_v59  ;;  %v594_v59 = vpack.c.b8 %v593_v6, %v593_v6 }
 0x184   : > { %1339 = vmatpush.msra.mxu3 %v1805_v49  ;;  %vm616_vm9 = vnez %v594_v59 }
 0x185   : > { %v632_v29 = vsel %vm616_vm9, 16843009, %v1501_v25 }
 0x186   : > { %1340 = vmatpush.msra.mxu3 %v1818_v16 }
 0x188   : > { %1341 = vmatpush.msra.mxu3 %v1842_v36  ;;  %v657_v36 = vunpack.c.0.s8 %v632_v29 }
 0x18a   : > { %1342 = vmatpush.msra.mxu3 %v1856_v44  ;;  %vm2019_vm10 = vcmp.ne.s32.totalorder %v657_v36, 0  ;;  %v563_v36 = vunpack.c.2.s8 %v1764_v50 }
 0x18c   : > { %1343 = vmatpush.msra.mxu3 %v1884_v9 }
 0x18e   : > { %1344 = vmatpush.msra.mxu3 %v1893_v27  ;;  %v658_v27 = vunpack.c.1.s8 %v632_v29  ;;  %v566_v29 = vunpack.c.3.s8 %v1767_v51 }
 0x18f   : > { %757 = vmax.xlane.f32.xlu1 %v756_v54 }
 0x190   : > { %754 = vmax.xlane.f32.xlu0 %v753_v57  ;;  %1345 = vmatpush.msra.mxu3 %v1904_v30  ;;  %vm690_vm13 = vcmp.ne.s32.totalorder %v658_v27, 0 }
 0x192   : > { %1346 = vmatpush.msra.mxu3 %v1912_v37 }
 0x194   : > { %1347 = vmatpush.msra.mxu3 %v1932_v52 }
 0x196   : > { %1348 = vmatpush.msra.mxu3 %v1940_v13 }
 0x197   : > { %v737_v15 = vpop.xlane.xlu2 %736 }
 0x198   : > { %v783_v49 = vsub.f32 %v1657_v17, %v737_v15  ;;  %v784_v19 = vsub.f32 %v1659_v18, %v737_v15  ;;  %1349 = vmatpush.msra.mxu3 %v1950_v55 }
 0x19a   : > { %v815_v16 = vmul.f32 1.442695, %v783_v49  ;;  %v817_v28 = vmul.f32 1.442695, %v784_v19  ;;  %1350 = vmatpush.msra.mxu3 %v1964_v14 }
 0x19c   : > { %1365 = vpow2.f32 %v815_v16  ;;  %1351 = vmatpush.msra.mxu3 %v1974_v35 }
 0x19d   : > { %1367 = vpow2.f32 %v817_v28  ;;  %v565_v28 = vunpack.c.3.s8 %v1764_v50 }
 0x19e   : > { %1352 = vmatpush.msra.mxu3 %v1982_v4 }
 0x19f   : > { %v740_v44 = vpop.xlane.xlu0 %739  ;;  %v354_v9 = vpop.permute.xlu2 %353  ;;  %v597_v27 = vpack.c.b16 %v566_v29, %v565_v28 }
 0x1a0   : > { %v785_v17 = vsub.f32 %v1668_v38, %v740_v44  ;;  %v786_v18 = vsub.f32 %v1670_v39, %v740_v44  ;;  %v409_v30 = vadd.f32 %v1634_v0, %v354_v9  ;;  %v410_v31 = vadd.f32 %v1636_v1, %v354_v9 }
 0x1a1   : > { %v564_v44 = vunpack.c.2.s8 %v1767_v51 }
 0x1a2   : > { %v1366_v52 = vpop.eup %1365  ;;  %v819_v34 = vmul.f32 1.442695, %v785_v17  ;;  %v821_v42 = vmul.f32 1.442695, %v786_v18  ;;  %v473_v43 = vmul.f32 0.2, %v409_v30 }
 0x1a3   : > { %v1368_v45 = vpop.eup %1367  ;;  %v474_v13 = vmul.f32 0.2, %v410_v31  ;;  %975 = vmatmul.f32.vlgmr.msra.gmra.mxu1 %v1366_v52  ;;  %vm441_vm11 = vcmp.gt.f32.partialorder %v409_v30, 0.0  ;;  %vm442_vm12 = vcmp.gt.f32.partialorder %v410_v31, 0.0  ;;  %v595_v18 = vpack.c.b16 %v564_v44, %v563_v36 }
 0x1a4   : > { %1369 = vpow2.f32 %v819_v34  ;;  %1040 = vmatmul.f32.vlgmr.msra.gmra.mxu2 %v1368_v45  ;;  %v505_v38 = vsel %vm441_vm11, %v409_v30, %v473_v43  ;;  %v2025_v39 = vadd.f32 %v1368_v45, %v1366_v52  ;;  %v598_v34 = vpack.c.b8 %v597_v27, %v597_v27 }
 0x1a5   : > { %1371 = vpow2.f32 %v821_v42  ;;  %v506_v5 = vsel %vm442_vm12, %v410_v31, %v474_v13  ;;  %v2029_v55 = vsel %vm2019_vm10, %v505_v38, -1e+12 }
 0x1a6   : > { %v2032_v53 = vsel %vm690_vm13, %v506_v5, -1e+12  ;;  %vm618_vm14 = vnez %v598_v34 }
 0x1a7   : > { %v762_v63 = vmax.f32 %v2029_v55, %v2032_v53  ;;  %v634_v45 = vsel %vm618_vm14, 16843009, %v1501_v25 }
 0x1a8   : > { %v662_v38 = vunpack.c.1.s8 %v634_v45 }
 0x1a9   : > { %763 = vmax.xlane.f32.xlu0 %v762_v63 }
 0x1aa   : > { %v1370_v14 = vpop.eup %1369  ;;  %vm2077_vm1 = vcmp.ne.s32.totalorder %v662_v38, 0 }
 0x1ab   : > { %v1372_v46 = vpop.eup %1371  ;;  %978 = vmatmul.f32.gmra.mxu1 %v1370_v14 }
 0x1ac   : > { %1043 = vmatmul.f32.gmra.mxu2 %v1372_v46  ;;  %v2037_v10 = vadd.f32 %v1372_v46, %v1370_v14 }
 0x1ad   : > { %v743_v56 = vpop.xlane.xlu1 %742 }
 0x1ae   : > { %v787_v54 = vsub.f32 %v1699_v20, %v743_v56  ;;  %v788_v57 = vsub.f32 %v1703_v21, %v743_v56 }
 0x1b0   : > { %v823_v35 = vmul.f32 1.442695, %v787_v54  ;;  %v825_v6 = vmul.f32 1.442695, %v788_v57 }
 0x1b2   : > { %1373 = vpow2.f32 %v823_v35 }
 0x1b3   : > { %1375 = vpow2.f32 %v825_v6 }
 0x1b5   : > { %v2049_v20 = vpop.xlane.xlu1 %775 }
 0x1b8   : > { %v2041_v59 = vpop.eup %1373 }
 0x1b9   : > { %v2043_v15 = vpop.eup %1375  ;;  %981 = vmatmul.f32.gmra.mxu1 %v2041_v59 }
 0x1ba   : > { %1046 = vmatmul.f32.gmra.mxu2 %v2043_v15 }
 0x1bd   : > { %v746_v4 = vpop.xlane.xlu0 %745 }
 0x1be   : > { %v789_v49 = vsub.f32 %v1726_v2, %v746_v4  ;;  %v790_v19 = vsub.f32 %v1728_v3, %v746_v4 }
 0x1bf   : > { %v752_v17 = vpop.xlane.xlu1 %751 }
 0x1c0   : > { %v827_v21 = vmul.f32 1.442695, %v789_v49  ;;  %v829_v16 = vmul.f32 1.442695, %v790_v19  ;;  %v793_v50 = vsub.f32 %v1732_v11, %v752_v17 }
 0x1c2   : > { %1377 = vpow2.f32 %v827_v21  ;;  %v835_v51 = vmul.f32 1.442695, %v793_v50 }
 0x1c3   : > { %1379 = vpow2.f32 %v829_v16 }
 0x1c5   : > { %v749_v9 = vpop.xlane.xlu0 %748 }
 0x1c6   : > { %v791_v2 = vsub.f32 %v1738_v22, %v749_v9  ;;  %v792_v3 = vsub.f32 %v1740_v23, %v749_v9  ;;  %v794_v22 = vsub.f32 %v1734_v12, %v752_v17  ;;  %v596_v23 = vpack.c.b8 %v595_v18, %v595_v18 }
 0x1c7   : > { %v661_v12 = vunpack.c.0.s8 %v634_v45 }
 0x1c8   : > { %v2057_v30 = vpop.eup %1377  ;;  %v831_v31 = vmul.f32 1.442695, %v791_v2  ;;  %v833_v37 = vmul.f32 1.442695, %v792_v3  ;;  %v837_v42 = vmul.f32 1.442695, %v794_v22  ;;  %vm617_vm15 = vnez %v596_v23 }
 0x1c9   : > { %v2059_v52 = vpop.eup %1379  ;;  %984 = vmatmul.f32.gmra.mxu1 %v2057_v30  ;;  %v633_v11 = vsel %vm617_vm15, 16843009, %v1501_v25  ;;  %vm2073_vm0 = vcmp.ne.s32.totalorder %v661_v12, 0 }
 0x1ca   : > { %1381 = vpow2.f32 %v831_v31  ;;  %1049 = vmatmul.f32.gmra.mxu2 %v2059_v52  ;;  %v659_v5 = vunpack.c.0.s8 %v633_v11  ;;  %v660_v63 = vunpack.c.1.s8 %v633_v11  ;;  %v888_v56 = vadd.f32 %v2059_v52, %v2057_v30 }
 0x1cb   : > { %1383 = vpow2.f32 %v833_v37 }
 0x1cc   : > { %1385 = vpow2.f32 %v835_v51  ;;  %vm2092_vm2 = vcmp.ne.s32.totalorder %v659_v5, 0  ;;  %vm2096_vm3 = vcmp.ne.s32.totalorder %v660_v63, 0 }
 0x1cd   : > { %1387 = vpow2.f32 %v837_v42 }
 0x1d0   : > { %v2065_v43 = vpop.eup %1381 }
 0x1d1   : > { %v2068_v13 = vpop.eup %1383  ;;  %987 = vmatmul.f32.gmra.mxu1 %v2065_v43 }
 0x1d2   : > { %1052 = vmatmul.f32.gmra.mxu2 %v2068_v13  ;;  %v2081_v57 = vpop.eup %1385 }
 0x1d3   : > { %v2087_v19 = vpop.eup %1387 }
 0x1d4   : > { %v894_v30 = vadd.f32 %v2087_v19, %v2081_v57 }
 0x1d7   : > { %v364_v14 = vpop.permute.xlu1 %363 }
 0x1d8   : > { %v773_v46 = vpop.xlane.xlu2 %772  ;;  %v413_v35 = vadd.f32 %v1634_v0, %v364_v14  ;;  %v414_v25 = vadd.f32 %v1636_v1, %v364_v14  ;;  %v359_v6 = vpop.permute.xlu0 %358 }
 0x1d9   : > { %v807_v4 = vsub.f32 %v1795_v60, %v773_v46  ;;  %v808_v49 = vsub.f32 %v1809_v8, %v773_v46  ;;  %v411_v21 = vadd.f32 %v1634_v0, %v359_v6  ;;  %v412_v16 = vadd.f32 %v1636_v1, %v359_v6  ;;  %990 = vmatmul.f32.gmra.mxu1 %v2081_v57 }
 0x1da   : > { %v477_v36 = vmul.f32 0.2, %v413_v35  ;;  %v478_v60 = vmul.f32 0.2, %v414_v25  ;;  %1055 = vmatmul.f32.gmra.mxu2 %v2087_v19  ;;  %v809_v0 = vsub.f32 %v1710_v32, %v2049_v20  ;;  %vm445_vm4 = vcmp.gt.f32.partialorder %v413_v35, 0.0 }
 0x1db   : > { %v863_v44 = vmul.f32 1.442695, %v807_v4  ;;  %v475_v8 = vmul.f32 0.2, %v411_v21  ;;  %v476_v1 = vmul.f32 0.2, %v412_v16  ;;  %v885_v4 = vadd.f32 %v2043_v15, %v2041_v59 }
 0x1dc   : > { %v865_v9 = vmul.f32 1.442695, %v808_v49  ;;  %vm446_vm5 = vcmp.gt.f32.partialorder %v414_v25, 0.0  ;;  %vm443_vm6 = vcmp.gt.f32.partialorder %v411_v21, 0.0  ;;  %v509_v27 = vsel %vm445_vm4, %v413_v35, %v477_v36 }
 0x1dd   : > { %1389 = vpow2.f32 %v863_v44  ;;  %v510_v2 = vsel %vm446_vm5, %v414_v25, %v478_v60  ;;  %vm444_vm7 = vcmp.gt.f32.partialorder %v412_v16, 0.0  ;;  %v2105_v3 = vsel %vm2073_vm0, %v509_v27, -1e+12 }
 0x1de   : > { %1391 = vpow2.f32 %v865_v9  ;;  %v2109_v17 = vsel %vm2077_vm1, %v510_v2, -1e+12  ;;  %v507_v32 = vsel %vm443_vm6, %v411_v21, %v475_v8  ;;  %v508_v18 = vsel %vm444_vm7, %v412_v16, %v476_v1 }
 0x1df   : > { %v867_v31 = vmul.f32 1.442695, %v809_v0  ;;  %v768_v37 = vmax.f32 %v2105_v3, %v2109_v17  ;;  %v2115_v50 = vsel %vm2092_vm2, %v507_v32, -1e+12  ;;  %v2119_v22 = vsel %vm2096_vm3, %v508_v18, -1e+12 }
 0x1e0   : > { %v779_v34 = vpop.xlane.xlu2 %778  ;;  %v765_v42 = vmax.f32 %v2115_v50, %v2119_v22  ;;  %v891_v35 = vadd.f32 %v2068_v13, %v2065_v43 }
 0x1e1   : > { %v811_v23 = vsub.f32 %v1862_v47, %v779_v34  ;;  %v812_v51 = vsub.f32 %v1866_v7, %v779_v34  ;;  %769 = vmax.xlane.f32.xlu0 %v768_v37  ;;  %1393 = vpow2.f32 %v867_v31 }
 0x1e2   : > { %766 = vmax.xlane.f32.xlu2 %v765_v42 }
 0x1e3   : > { %v1390_v45 = vpop.eup %1389  ;;  %v871_v11 = vmul.f32 1.442695, %v811_v23  ;;  %v873_v12 = vmul.f32 1.442695, %v812_v51 }
 0x1e4   : > { %v1392_v38 = vpop.eup %1391  ;;  %1011 = vmatmul.f32.vlgmr.msrb.gmra.mxu3 %v1390_v45 }
 0x1e5   : > { %1395 = vpow2.f32 %v871_v11  ;;  %v915_v5 = vadd.f32 %v1392_v38, %v1390_v45 }
 0x1e6   : > { %1397 = vpow2.f32 %v873_v12 }
 0x1e7   : > { %916 = vadd.xlane.f32.xlu1 %v915_v5  ;;  %v2125_v14 = vpop.eup %1393 }
 0x1e8   : > { %v782_v63 = vpop.xlane.xlu2 %781 }
 0x1e9   : > { %883 = vadd.xlane.f32.xlu0 %v2037_v10  ;;  %v813_v46 = vsub.f32 %v1874_v62, %v782_v63 }
 0x1ea   : > { %880 = vadd.xlane.f32.xlu2 %v2025_v39 }
 0x1eb   : > { %v1396_v47 = vpop.eup %1395  ;;  %v875_v6 = vmul.f32 1.442695, %v813_v46 }
 0x1ec   : > { %v1398_v7 = vpop.eup %1397  ;;  %1014 = vmatmul.f32.gmra.mxu3 %v2125_v14 }
 0x1ed   : > { %v2133_v54 = vadd.f32 %v1398_v7, %v1396_v47  ;;  %1399 = vpow2.f32 %v875_v6 }
 0x1ef   : > { %889 = vadd.xlane.f32.xlu1 %v888_v56 }
 0x1f0   : > { %v761_v25 = vpop.xlane.xlu2 %760 }
 0x1f1   : > { %v799_v10 = vsub.f32 %v1915_v40, %v761_v25  ;;  %v800_v39 = vsub.f32 %v1917_v41, %v761_v25  ;;  %892 = vadd.xlane.f32.xlu0 %v891_v35  ;;  %v810_v41 = vsub.f32 %v1712_v33, %v2049_v20 }
 0x1f2   : > { %886 = vadd.xlane.f32.xlu2 %v885_v4 }
 0x1f3   : > { %v847_v62 = vmul.f32 1.442695, %v799_v10  ;;  %v849_v49 = vmul.f32 1.442695, %v800_v39  ;;  %v1400_v52 = vpop.eup %1399  ;;  %v869_v59 = vmul.f32 1.442695, %v810_v41 }
 0x1f4   : > { %1017 = vmatmul.f32.gmra.mxu3 %v1396_v47 }
 0x1f5   : > { %1401 = vpow2.f32 %v847_v62 }
 0x1f6   : > { %1403 = vpow2.f32 %v849_v49 }
 0x1f7   : > { %1405 = vpow2.f32 %v869_v59 }
 0x1fa   : > { %895 = vadd.xlane.f32.xlu2 %v894_v30 }
 0x1fb   : > { %v1402_v40 = vpop.eup %1401 }
 0x1fc   : > { %1020 = vmatmul.f32.gmra.mxu3 %v1400_v52  ;;  %v1404_v43 = vpop.eup %1403 }
 0x1fd   : > { %v903_v15 = vadd.f32 %v1404_v43, %v1402_v40  ;;  %v2149_v20 = vpop.eup %1405 }
 0x202   : > { %904 = vadd.xlane.f32.xlu2 %v903_v15  ;;  %v758_v13 = vpop.xlane.xlu1 %757 }
 0x203   : > { %v797_v21 = vsub.f32 %v1987_v58, %v758_v13  ;;  %v798_v16 = vsub.f32 %v1989_v61, %v758_v13  ;;  %v755_v28 = vpop.xlane.xlu0 %754  ;;  %v814_v58 = vsub.f32 %v1876_v48, %v782_v63 }
 0x204   : > { %1076 = vmatmul.f32.vlgmr.msra.gmra.mxu3 %v1392_v38  ;;  %v795_v57 = vsub.f32 %v1994_v24, %v755_v28  ;;  %v796_v19 = vsub.f32 %v1996_v26, %v755_v28 }
 0x205   : > { %v843_v29 = vmul.f32 1.442695, %v797_v21  ;;  %v845_v36 = vmul.f32 1.442695, %v798_v16  ;;  %v877_v26 = vmul.f32 1.442695, %v814_v58 }
 0x206   : > { %v839_v60 = vmul.f32 1.442695, %v795_v57  ;;  %v841_v33 = vmul.f32 1.442695, %v796_v19 }
 0x207   : > { %1407 = vpow2.f32 %v843_v29 }
 0x208   : > { %1409 = vpow2.f32 %v845_v36 }
 0x209   : > { %1411 = vpow2.f32 %v839_v60 }
 0x20a   : > { %1413 = vpow2.f32 %v841_v33 }
 0x20b   : > { %1415 = vpow2.f32 %v877_v26 }
 0x20c   : > { %1079 = vmatmul.f32.gmra.mxu3 %v2149_v20 }
 0x20d   : > { %v1408_v61 = vpop.eup %1407 }
 0x20e   : > { %v1410_v44 = vpop.eup %1409 }
 0x20f   : > { %v1412_v0 = vpop.eup %1411  ;;  %v900_v24 = vadd.f32 %v1410_v44, %v1408_v61 }
 0x210   : > { %v1414_v8 = vpop.eup %1413  ;;  %993 = vmatmul.f32.gmra.mxu1 %v1412_v0 }
 0x211   : > { %1058 = vmatmul.f32.gmra.mxu2 %v1414_v8  ;;  %901 = vadd.xlane.f32.xlu0 %v900_v24  ;;  %v897_v1 = vadd.f32 %v1414_v8, %v1412_v0  ;;  %v1416_v9 = vpop.eup %1415  ;;  %v918_v8 = vadd.f32 %v2149_v20, %v2125_v14 }
 0x212   : > { %v924_v23 = vadd.f32 %v1416_v9, %v1400_v52 }
 0x213   : > { %898 = vadd.xlane.f32.xlu1 %v897_v1 }
 0x214   : > { %1082 = vmatmul.f32.gmra.mxu3 %v1398_v7 }
 0x218   : > { %996 = vmatmul.f32.gmra.mxu1 %v1408_v61 }
 0x219   : > { %1061 = vmatmul.f32.gmra.mxu2 %v1410_v44 }
 0x21c   : > { %v764_v27 = vpop.xlane.xlu0 %763  ;;  %1085 = vmatmul.f32.gmra.mxu3 %v1416_v9 }
 0x21d   : > { %v801_v48 = vsub.f32 %v2029_v55, %v764_v27  ;;  %v802_v2 = vsub.f32 %v2032_v53, %v764_v27 }
 0x21f   : > { %v851_v32 = vmul.f32 1.442695, %v801_v48  ;;  %v853_v18 = vmul.f32 1.442695, %v802_v2 }
 0x220   : > { %999 = vmatmul.f32.gmra.mxu1 %v1402_v40  ;;  %v976_v42 = vpop.f32.mrf.mxu1 }
 0x221   : > { %1417 = vpow2.f32 %v851_v32  ;;  %1064 = vmatmul.f32.gmra.mxu2 %v1404_v43 }
 0x222   : > { %1419 = vpow2.f32 %v853_v18 }
 0x227   : > { %v1418_v31 = vpop.eup %1417  ;;  %v1041_v51 = vpop.f32.mrf.mxu2 }
 0x228   : > { %v1420_v37 = vpop.eup %1419  ;;  %1002 = vmatmul.f32.gmra.mxu1 %v1418_v31  ;;  %v979_v55 = vpop.f32.mrf.mxu1  ;;  %v1042_v43 = vadd.f32 %v1041_v51, %v976_v42 }
 0x229   : > { %v906_v34 = vadd.f32 %v1420_v37, %v1418_v31  ;;  %1067 = vmatmul.f32.gmra.mxu2 %v1420_v37 }
 0x22b   : > { %907 = vadd.xlane.f32.xlu1 %v906_v34 }
 0x22f   : > { %v1044_v45 = vpop.f32.mrf.mxu2 }
 0x230   : > { %v1045_v52 = vadd.f32 %v1044_v45, %v979_v55 }
 0x233   : > { %925 = vadd.xlane.f32.xlu1 %v924_v23 }
 0x236   : > { %v982_v63 = vpop.f32.mrf.mxu1 }
 0x23d   : > { %v1047_v11 = vpop.f32.mrf.mxu2 }
 0x23e   : > { %v1048_v0 = vadd.f32 %v1047_v11, %v982_v63 }
 0x246   : > { %v985_v39 = vpop.f32.mrf.mxu1 }
 0x24d   : > { %v1050_v10 = vpop.f32.mrf.mxu2 }
 0x24e   : > { %v1051_v19 = vadd.f32 %v1050_v10, %v985_v39  ;;  %v988_v60 = vpop.f32.mrf.mxu1 }
 0x254   : > { %v770_v53 = vpop.xlane.xlu0 %769 }
 0x255   : > { %v805_v12 = vsub.f32 %v2105_v3, %v770_v53  ;;  %v806_v38 = vsub.f32 %v2109_v17, %v770_v53  ;;  %v767_v5 = vpop.xlane.xlu2 %766  ;;  %v1053_v16 = vpop.f32.mrf.mxu2 }
 0x256   : > { %v803_v47 = vsub.f32 %v2115_v50, %v767_v5  ;;  %v804_v7 = vsub.f32 %v2119_v22, %v767_v5  ;;  %v1054_v61 = vadd.f32 %v1053_v16, %v988_v60  ;;  %v991_v37 = vpop.f32.mrf.mxu1 }
 0x257   : > { %v859_v46 = vmul.f32 1.442695, %v805_v12  ;;  %v861_v56 = vmul.f32 1.442695, %v806_v38 }
 0x258   : > { %v855_v35 = vmul.f32 1.442695, %v803_v47  ;;  %v857_v25 = vmul.f32 1.442695, %v804_v7 }
 0x259   : > { %1421 = vpow2.f32 %v859_v46 }
 0x25a   : > { %v2159_v6 = vpop.xlane.xlu1 %916  ;;  %1423 = vpow2.f32 %v861_v56 }
 0x25b   : > { %1425 = vpow2.f32 %v855_v35 }
 0x25c   : > { %1427 = vpow2.f32 %v857_v25  ;;  %v884_v3 = vpop.xlane.xlu0 %883 }
 0x25d   : > { %v881_v17 = vpop.xlane.xlu2 %880  ;;  %1429 = vrcp.f32 %v884_v3 }
 0x25e   : > { %1431 = vrcp.f32 %v881_v17 }
 0x25f   : > { %v1422_v4 = vpop.eup %1421 }
 0x260   : > { %v1424_v50 = vpop.eup %1423 }
 0x261   : > { %v1426_v22 = vpop.eup %1425  ;;  %v912_v49 = vadd.f32 %v1424_v50, %v1422_v4 }
 0x262   : > { %v890_v62 = vpop.xlane.xlu1 %889  ;;  %v1428_v30 = vpop.eup %1427  ;;  %1005 = vmatmul.f32.gmra.mxu1 %v1426_v22 }
 0x263   : > { %1433 = vrcp.f32 %v890_v62  ;;  %1070 = vmatmul.f32.gmra.mxu2 %v1428_v30  ;;  %913 = vadd.xlane.f32.xlu2 %v912_v49  ;;  %v909_v40 = vadd.f32 %v1428_v30, %v1426_v22  ;;  %v1430_v41 = vpop.eup %1429 }
 0x264   : > { %v893_v59 = vpop.xlane.xlu0 %892  ;;  %v1432_v15 = vpop.eup %1431  ;;  %v1106_v13 = vmul.f32 %v1430_v41, %v1045_v52 }
 0x265   : > { %910 = vadd.xlane.f32.xlu0 %v909_v40  ;;  %1435 = vrcp.f32 %v893_v59  ;;  %v887_v21 = vpop.xlane.xlu2 %886  ;;  %v1105_v28 = vmul.f32 %v1432_v15, %v1042_v43 }
 0x266   : > { %1437 = vrcp.f32 %v887_v21  ;;  %v1139_v29 = vmul.f32 1.442695, %v1106_v13  ;;  %vm1122_vm8 = vcmp.gt.f32.partialorder %v1106_v13, 0.0 }
 0x267   : > { %v2166_v57 = vpop.f32.mrf.mxu3  ;;  %v1137_v33 = vmul.f32 1.442695, %v1105_v28  ;;  %vm1121_vm9 = vcmp.gt.f32.partialorder %v1105_v28, 0.0 }
 0x268   : > { %1439 = vpow2.f32 %v1139_v29 }
 0x269   : > { %v1434_v36 = vpop.eup %1433  ;;  %1441 = vpow2.f32 %v1137_v33 }
 0x26a   : > { %v1108_v58 = vmul.f32 %v1434_v36, %v1051_v19  ;;  %1008 = vmatmul.f32.gmra.mxu1 %v1422_v4 }
 0x26b   : > { %v1436_v44 = vpop.eup %1435  ;;  %1073 = vmatmul.f32.gmra.mxu2 %v1424_v50  ;;  %922 = vadd.xlane.f32.xlu2 %v2133_v54  ;;  %v1056_v54 = vpop.f32.mrf.mxu2 }
 0x26c   : > { %v1143_v24 = vmul.f32 1.442695, %v1108_v58  ;;  %v1438_v26 = vpop.eup %1437  ;;  %v1109_v1 = vmul.f32 %v1436_v44, %v1054_v61  ;;  %v1057_v51 = vadd.f32 %v1056_v54, %v991_v37  ;;  %vm1124_vm10 = vcmp.gt.f32.partialorder %v1108_v58, 0.0 }
 0x26d   : > { %v1107_v9 = vmul.f32 %v1438_v26, %v1048_v0  ;;  %919 = vadd.xlane.f32.xlu0 %v918_v8  ;;  %v896_v27 = vpop.xlane.xlu2 %895 }
 0x26e   : > { %1443 = vpow2.f32 %v1143_v24  ;;  %v1145_v48 = vmul.f32 1.442695, %v1109_v1  ;;  %v1440_v32 = vpop.eup %1439  ;;  %vm1125_vm11 = vcmp.gt.f32.partialorder %v1109_v1, 0.0 }
 0x26f   : > { %1445 = vrcp.f32 %v896_v27  ;;  %v1015_v2 = vpop.f32.mrf.mxu3  ;;  %v1141_v18 = vmul.f32 1.442695, %v1107_v9  ;;  %v1442_v31 = vpop.eup %1441  ;;  %v1287_v14 = vadd.f32 -1.0, %v1440_v32  ;;  %vm1123_vm12 = vcmp.gt.f32.partialorder %v1107_v9, 0.0 }
 0x270   : > { %1447 = vpow2.f32 %v1145_v48  ;;  %v1286_v20 = vadd.f32 -1.0, %v1442_v31 }
 0x271   : > { %1449 = vpow2.f32 %v1141_v18  ;;  %v1186_v34 = vsel %vm1122_vm8, %v1106_v13, %v1287_v14 }
 0x272   : > { %1202 = vst [vmem:[%s2176_s6 + $0x8] sm:$0xff] %v1186_v34  ;;  %v1185_v42 = vsel %vm1121_vm9, %v1105_v28, %v1286_v20 }
 0x273   : > { %1201 = vst [vmem:[%s2176_s6] sm:$0xff] %v1185_v42 }
 0x274   : > { %v1444_v23 = vpop.eup %1443 }
 0x275   : > { %v1446_v45 = vpop.eup %1445  ;;  %v1289_v55 = vadd.f32 -1.0, %v1444_v23  ;;  %v905_v36 = vpop.xlane.xlu2 %904 }
 0x276   : > { %v1110_v11 = vmul.f32 %v1446_v45, %v1057_v51  ;;  %v1448_v53 = vpop.eup %1447 }
 0x277   : > { %v1188_v12 = vsel %vm1124_vm10, %v1108_v58, %v1289_v55  ;;  %v1018_v38 = vpop.f32.mrf.mxu3  ;;  %v1450_v5 = vpop.eup %1449  ;;  %v1290_v63 = vadd.f32 -1.0, %v1448_v53 }
 0x278   : > { %1204 = vst [vmem:[%s2176_s6 + $0x18] sm:$0xff] %v1188_v12  ;;  %v1147_v47 = vmul.f32 1.442695, %v1110_v11  ;;  %v1288_v7 = vadd.f32 -1.0, %v1450_v5  ;;  %vm1126_vm13 = vcmp.gt.f32.partialorder %v1110_v11, 0.0 }
 0x279   : > { %v1189_v46 = vsel %vm1125_vm11, %v1109_v1, %v1290_v63 }
 0x27a   : > { %1451 = vpow2.f32 %v1147_v47  ;;  %1205 = vst [vmem:[%s2176_s6 + $0x20] sm:$0xff] %v1189_v46  ;;  %v1187_v56 = vsel %vm1123_vm12, %v1107_v9, %v1288_v7 }
 0x27b   : > { %1203 = vst [vmem:[%s2176_s6 + $0x10] sm:$0xff] %v1187_v56  ;;  %1453 = vrcp.f32 %v2159_v6 }
 0x27f   : > { %v1021_v35 = vpop.f32.mrf.mxu3 }
 0x280   : > { %v1452_v25 = vpop.eup %1451 }
 0x281   : > { %v1291_v10 = vadd.f32 -1.0, %v1452_v25  ;;  %v1454_v4 = vpop.eup %1453 }
 0x283   : > { %v1190_v3 = vsel %vm1126_vm13, %v1110_v11, %v1291_v10 }
 0x284   : > { %1206 = vst [vmem:[%s2176_s6 + $0x28] sm:$0xff] %v1190_v3  ;;  %v902_v6 = vpop.xlane.xlu0 %901 }
 0x286   : > { %v899_v62 = vpop.xlane.xlu1 %898 }
 0x287   : > { %v1077_v17 = vpop.f32.mrf.mxu3 }
 0x288   : > { %v1078_v39 = vadd.f32 %v1077_v17, %v2166_v57 }
 0x28a   : > { %v1117_v50 = vmul.f32 %v1454_v4, %v1078_v39 }
 0x28c   : > { %v1161_v22 = vmul.f32 1.442695, %v1117_v50  ;;  %vm1133_vm14 = vcmp.gt.f32.partialorder %v1117_v50, 0.0 }
 0x28d   : > { %v994_v49 = vpop.f32.mrf.mxu1 }
 0x28e   : > { %1455 = vpow2.f32 %v1161_v22 }
 0x28f   : > { %v1080_v30 = vpop.f32.mrf.mxu3  ;;  %1457 = vrcp.f32 %v899_v62 }
 0x290   : > { %v2186_v52 = vadd.f32 %v1080_v30, %v1015_v2  ;;  %1459 = vrcp.f32 %v902_v6 }
 0x294   : > { %v1456_v40 = vpop.eup %1455  ;;  %v1059_v43 = vpop.f32.mrf.mxu2 }
 0x295   : > { %v1298_v41 = vadd.f32 -1.0, %v1456_v40  ;;  %v1060_v59 = vadd.f32 %v1059_v43, %v994_v49  ;;  %v1458_v15 = vpop.eup %1457  ;;  %v997_v57 = vpop.f32.mrf.mxu1 }
 0x296   : > { %v1460_v58 = vpop.eup %1459 }
 0x297   : > { %v1197_v13 = vsel %vm1133_vm14, %v1117_v50, %v1298_v41  ;;  %v1083_v21 = vpop.f32.mrf.mxu3  ;;  %v1111_v16 = vmul.f32 %v1458_v15, %v1060_v59 }
 0x298   : > { %1213 = vst [vmem:[%s2176_s6 + $0x60] sm:$0xff] %v1197_v13  ;;  %v2189_v28 = vadd.f32 %v1083_v21, %v1018_v38 }
 0x299   : > { %v1149_v19 = vmul.f32 1.442695, %v1111_v16  ;;  %vm1127_vm15 = vcmp.gt.f32.partialorder %v1111_v16, 0.0 }
 0x29b   : > { %1461 = vpow2.f32 %v1149_v19 }
 0x29c   : > { %v1062_v29 = vpop.f32.mrf.mxu2  ;;  %1463 = vrcp.f32 %v905_v36 }
 0x29d   : > { %v1063_v60 = vadd.f32 %v1062_v29, %v997_v57  ;;  %v1000_v8 = vpop.f32.mrf.mxu1 }
 0x29e   : > { %v908_v33 = vpop.xlane.xlu1 %907 }
 0x29f   : > { %v1112_v61 = vmul.f32 %v1460_v58, %v1063_v60  ;;  %v1086_v32 = vpop.f32.mrf.mxu3 }
 0x2a0   : > { %v1087_v54 = vadd.f32 %v1086_v32, %v1021_v35 }
 0x2a1   : > { %v1462_v44 = vpop.eup %1461  ;;  %v1151_v0 = vmul.f32 1.442695, %v1112_v61  ;;  %vm1128_vm0 = vcmp.gt.f32.partialorder %v1112_v61, 0.0 }
 0x2a2   : > { %v1292_v24 = vadd.f32 -1.0, %v1462_v44  ;;  %v1464_v48 = vpop.eup %1463 }
 0x2a3   : > { %1465 = vpow2.f32 %v1151_v0 }
 0x2a4   : > { %v1191_v26 = vsel %vm1127_vm15, %v1111_v16, %v1292_v24  ;;  %v1065_v1 = vpop.f32.mrf.mxu2 }
 0x2a5   : > { %1207 = vst [vmem:[%s2176_s6 + $0x30] sm:$0xff] %v1191_v26  ;;  %v1066_v9 = vadd.f32 %v1065_v1, %v1000_v8  ;;  %v1003_v34 = vpop.f32.mrf.mxu1 }
 0x2a6   : > { %v926_v27 = vpop.xlane.xlu1 %925 }
 0x2a7   : > { %1467 = vrcp.f32 %v926_v27  ;;  %v1113_v2 = vmul.f32 %v1464_v48, %v1066_v9 }
 0x2a8   : > { %1469 = vrcp.f32 %v908_v33 }
 0x2a9   : > { %v1466_v18 = vpop.eup %1465  ;;  %v1153_v31 = vmul.f32 1.442695, %v1113_v2  ;;  %vm1129_vm1 = vcmp.gt.f32.partialorder %v1113_v2, 0.0 }
 0x2aa   : > { %v1293_v14 = vadd.f32 -1.0, %v1466_v18 }
 0x2ab   : > { %1471 = vpow2.f32 %v1153_v31 }
 0x2ac   : > { %v1192_v37 = vsel %vm1128_vm0, %v1112_v61, %v1293_v14  ;;  %v1068_v23 = vpop.f32.mrf.mxu2 }
 0x2ad   : > { %v1468_v20 = vpop.eup %1467  ;;  %1208 = vst [vmem:[%s2176_s6 + $0x38] sm:$0xff] %v1192_v37  ;;  %v1069_v42 = vadd.f32 %v1068_v23, %v1003_v34 }
 0x2ae   : > { %v1120_v51 = vmul.f32 %v1468_v20, %v1087_v54  ;;  %v1470_v45 = vpop.eup %1469 }
 0x2af   : > { %v1114_v11 = vmul.f32 %v1470_v45, %v1069_v42 }
 0x2b0   : > { %v1167_v55 = vmul.f32 1.442695, %v1120_v51  ;;  %vm1136_vm2 = vcmp.gt.f32.partialorder %v1120_v51, 0.0 }
 0x2b1   : > { %v1472_v53 = vpop.eup %1471  ;;  %v1155_v12 = vmul.f32 1.442695, %v1114_v11  ;;  %vm1130_vm3 = vcmp.gt.f32.partialorder %v1114_v11, 0.0 }
 0x2b2   : > { %1473 = vpow2.f32 %v1167_v55  ;;  %v1294_v38 = vadd.f32 -1.0, %v1472_v53 }
 0x2b3   : > { %1475 = vpow2.f32 %v1155_v12 }
 0x2b4   : > { %v1193_v5 = vsel %vm1129_vm1, %v1113_v2, %v1294_v38 }
 0x2b5   : > { %1209 = vst [vmem:[%s2176_s6 + $0x40] sm:$0xff] %v1193_v5 }
 0x2b8   : > { %v1474_v63 = vpop.eup %1473 }
 0x2b9   : > { %v1301_v47 = vadd.f32 -1.0, %v1474_v63  ;;  %v1476_v7 = vpop.eup %1475 }
 0x2ba   : > { %v1295_v56 = vadd.f32 -1.0, %v1476_v7 }
 0x2bb   : > { %v1200_v46 = vsel %vm1136_vm2, %v1120_v51, %v1301_v47 }
 0x2bc   : > { %1216 = vst [vmem:[%s2176_s6 + $0x78] sm:$0xff] %v1200_v46  ;;  %v1194_v35 = vsel %vm1130_vm3, %v1114_v11, %v1295_v56 }
 0x2bd   : > { %1210 = vst [vmem:[%s2176_s6 + $0x48] sm:$0xff] %v1194_v35 }
 0x2d6   : > { %v914_v25 = vpop.xlane.xlu2 %913 }
 0x2d8   : > { %v911_v10 = vpop.xlane.xlu0 %910 }
 0x2de   : > { %v923_v3 = vpop.xlane.xlu2 %922 }
 0x2df   : > { %1477 = vrcp.f32 %v923_v3  ;;  %v1006_v39 = vpop.f32.mrf.mxu1 }
 0x2e0   : > { %v920_v17 = vpop.xlane.xlu0 %919 }
 0x2e1   : > { %1479 = vrcp.f32 %v920_v17 }
 0x2e2   : > { %1481 = vrcp.f32 %v911_v10 }
 0x2e3   : > { %1483 = vrcp.f32 %v914_v25 }
 0x2e5   : > { %v1478_v4 = vpop.eup %1477 }
 0x2e6   : > { %v1119_v50 = vmul.f32 %v1478_v4, %v2189_v28  ;;  %v1071_v22 = vpop.f32.mrf.mxu2 }
 0x2e7   : > { %v1480_v62 = vpop.eup %1479  ;;  %v1072_v49 = vadd.f32 %v1071_v22, %v1006_v39  ;;  %v1009_v15 = vpop.f32.mrf.mxu1 }
 0x2e8   : > { %v1482_v30 = vpop.eup %1481  ;;  %v1165_v40 = vmul.f32 1.442695, %v1119_v50  ;;  %v1118_v41 = vmul.f32 %v1480_v62, %v2186_v52  ;;  %vm1135_vm4 = vcmp.gt.f32.partialorder %v1119_v50, 0.0 }
 0x2e9   : > { %v1115_v43 = vmul.f32 %v1482_v30, %v1072_v49  ;;  %v1484_v21 = vpop.eup %1483 }
 0x2ea   : > { %1485 = vpow2.f32 %v1165_v40  ;;  %v1163_v6 = vmul.f32 1.442695, %v1118_v41  ;;  %vm1134_vm5 = vcmp.gt.f32.partialorder %v1118_v41, 0.0 }
 0x2eb   : > { %v1157_v59 = vmul.f32 1.442695, %v1115_v43  ;;  %vm1131_vm6 = vcmp.gt.f32.partialorder %v1115_v43, 0.0 }
 0x2ec   : > { %1487 = vpow2.f32 %v1163_v6 }
 0x2ed   : > { %1489 = vpow2.f32 %v1157_v59 }
 0x2ee   : > { %v1074_v13 = vpop.f32.mrf.mxu2 }
 0x2ef   : > { %v1075_v16 = vadd.f32 %v1074_v13, %v1009_v15 }
 0x2f0   : > { %v1486_v28 = vpop.eup %1485 }
 0x2f1   : > { %v1300_v57 = vadd.f32 -1.0, %v1486_v28  ;;  %v1116_v19 = vmul.f32 %v1484_v21, %v1075_v16 }
 0x2f2   : > { %v1488_v29 = vpop.eup %1487 }
 0x2f3   : > { %v1490_v52 = vpop.eup %1489  ;;  %v1199_v36 = vsel %vm1135_vm4, %v1119_v50, %v1300_v57  ;;  %v1299_v60 = vadd.f32 -1.0, %v1488_v29  ;;  %v1159_v33 = vmul.f32 1.442695, %v1116_v19  ;;  %vm1132_vm7 = vcmp.gt.f32.partialorder %v1116_v19, 0.0 }
 0x2f4   : > { %1215 = vst [vmem:[%s2176_s6 + $0x70] sm:$0xff] %v1199_v36  ;;  %v1296_v58 = vadd.f32 -1.0, %v1490_v52 }
 0x2f5   : > { %v1198_v61 = vsel %vm1134_vm5, %v1118_v41, %v1299_v60  ;;  %1491 = vpow2.f32 %v1159_v33 }
 0x2f6   : > { %1214 = vst [vmem:[%s2176_s6 + $0x68] sm:$0xff] %v1198_v61  ;;  %v1195_v44 = vsel %vm1131_vm6, %v1115_v43, %v1296_v58 }
 0x2f7   : > { %1211 = vst [vmem:[%s2176_s6 + $0x50] sm:$0xff] %v1195_v44 }
 0x2fb   : > { %v1492_v0 = vpop.eup %1491 }
 0x2fc   : > { %v1297_v24 = vadd.f32 -1.0, %v1492_v0 }
 0x2fe   : > { %v1196_v8 = vsel %vm1132_vm7, %v1116_v19, %v1297_v24 }
 0x2ff   : > { %1212 = vst [vmem:[%s2176_s6 + $0x58] sm:$0xff] %v1196_v8 }
 0x300 PF: > { %s14_s15 = sadd.s32 1, %s1499_s15  }
 0x301   : > { %p11_p5 = scmp.ge.s32.totalorder %s14_s15, 4  }
 0x303   :  { %13 = sbr.rel (!%p11_p5) target bundleno = 1 (0x1), region = 67 }

</bundles_post_ra>
